<compile_context>
chip_gen: v5e
topology: v5e:2x2
jax: 0.10.0
libtpu: 0.0.40
codegen_flags: <defaults>
</compile_context>

<pallas_src>
import functools

import jax
import jax.numpy as jnp
from jax import lax
from jax.experimental import pallas as pl
from jax.experimental.pallas import tpu as pltpu

HIDDEN = 128          # GRU hidden size (fixed by the module)
FC1 = 256             # fc1 width (fixed by the module)
CP = 128              # padded channel / class / lane width
BN_EPS = 1e-5         # PyTorch BatchNorm2d default eps
MAX_GROUP = 128       # max batches per grid step (fills v6e's 256-wide MXU)
TAPS = 8              # conv1 im2col lanes (3 real taps, zero-padded to 8)


def _round_up(n, m):
    return ((n + m - 1) // m) * m


def _pick_group(B, H):
    """Batches per grid step.

    gB shrinks as H grows so the live conv activation slabs (~3 x (H*gB,128)
    f32) stay near ~8 MiB, fitting v7x's 64 MiB VMEM with weights plus
    double-buffering headroom.
    """
    rows_budget = (8 << 20) // (3 * CP * 4)
    cap = max(8, min(MAX_GROUP, (rows_budget // max(H, 1)) // 8 * 8))
    return max(8, min(_round_up(B, 8), cap))
    # TODO(synk): for very large input_features, a true H-tiled grid (with a
    #             gB-row halo for the conv taps) would also keep G >= 2 on
    #             v7x at small batch; here we only shrink gB.


# ------------------------------ fused kernel -------------------------------

def _make_fused_kernel(gB, H, Q):
    """Whole-forward kernel for one group of `gB` batches.

    Activation slabs are (rows, CP) with rows ordered m = h * gB + b_local.
    """
    H1, H2 = H // 2, H // 4
    M1 = H1 * gB

    def sigmoid(v):                        # stable; tanh runs on the EUP slot
        return 0.5 * (jnp.tanh(0.5 * v) + 1.0)

    def kernel(x_ref, w1t_ref, s1_ref, t1_ref, w2k_ref, s2_ref, t2_ref,
               wih_ref, bg_ref, bhn_ref, w1f_ref, b1f_ref, w2f_ref, b2f_ref,
               o_ref, acc2_ref, p2p_ref, gi_ref):
        f32 = jnp.float32

        # ---- conv1: Cin == 1, 3 taps folded into the 8 input lanes -> one
        #      matmul.  Then eval-BN (folded scale/shift) + ReLU.
        y1 = jnp.dot(x_ref[...], w1t_ref[...], preferred_element_type=f32)
        y1 = jnp.maximum(y1 * s1_ref[...] + t1_ref[...], 0.0)
        # MaxPool((2,1)) along h: rows are ordered m = h*gB + b.
        y1 = y1.reshape(H1, 2 * gB, CP)
        p1 = jnp.maximum(y1[:, :gB, :], y1[:, gB:, :]).reshape(M1, CP)

        # ---- conv2: 3 accumulated matmuls against row-shifted *slices* of p1
        #      written into a VMEM scratch (no concatenated shifted copies).
        acc2_ref[...] = jnp.dot(p1, w2k_ref[1], preferred_element_type=f32)
        if H1 > 1:
            sh = M1 - gB
            acc2_ref[pl.ds(gB, sh), :] += jnp.dot(
                p1[:sh, :], w2k_ref[0], preferred_element_type=f32)
            acc2_ref[pl.ds(0, sh), :] += jnp.dot(
                p1[gB:, :], w2k_ref[2], preferred_element_type=f32)
        y2 = jnp.maximum(acc2_ref[...] * s2_ref[...] + t2_ref[...], 0.0)

        # ---- MaxPool((2,1)) fused with packing h'-pairs into the 128 lanes:
        #      p2p[q*gB+b, 0:64]   = pooled channels at h' = 2q
        #      p2p[q*gB+b, 64:128] = pooled channels at h' = 2q+1
        # (y2 lanes 64..127 are exactly zero, so roll+add interleaves cleanly.)
        Qe = H2 // 2
        if Qe > 0:
            blk = y2[:Qe * 4 * gB, :].reshape(Qe, 4 * gB, CP)
            even = jnp.maximum(blk[:, :gB, :],
                               blk[:, gB:2 * gB, :]).reshape(Qe * gB, CP)
            odd = jnp.maximum(blk[:, 2 * gB:3 * gB, :],
                              blk[:, 3 * gB:, :]).reshape(Qe * gB, CP)
            p2p_ref[pl.ds(0, Qe * gB), :] = even + pltpu.roll(odd, shift=64,
                                                              axis=1)
        if H2 % 2 == 1:                    # odd H2: last pooled row has no pair
            tail = jnp.maximum(y2[(H1 - 2) * gB:(H1 - 1) * gB, :],
                               y2[(H1 - 1) * gB:, :])
            p2p_ref[pl.ds(Qe * gB, gB), :] = tail

        # ---- GRU input projection: Q matmuls, each with full 128-lane K.
        #      (NCHW flatten order is folded into wih at prepare time.)
        gi_ref[...] = jnp.zeros((gB, 3 * HIDDEN), f32)

        def gru_step(q, carry):
            r0 = pl.multiple_of(q * gB, 8)
            w0 = pl.multiple_of(q * CP, CP)
            gi_ref[...] += jnp.dot(p2p_ref[pl.ds(r0, gB), :],
                                   wih_ref[pl.ds(w0, CP), :],
                                   preferred_element_type=f32)
            return carry

        lax.fori_loop(0, Q, gru_step, 0, unroll=(Q <= 8))
        gi = gi_ref[...] + bg_ref[...]     # b_ih (+ b_hh for r,z) pre-folded

        # ---- single-timestep GRU, h0 == 0, PyTorch gate order (r, z, n)
        r = sigmoid(gi[:, 0:HIDDEN])
        z = sigmoid(gi[:, HIDDEN:2 * HIDDEN])
        n = jnp.tanh(gi[:, 2 * HIDDEN:3 * HIDDEN] + r * bhn_ref[...])
        h = (1.0 - z) * n                  # + z * h0, with h0 == 0

        # ---- fc1 + ReLU (dropout: eval -> identity)
        a1 = jnp.maximum(
            jnp.dot(h, w1f_ref[...], preferred_element_type=f32)
            + b1f_ref[...], 0.0)
        # fc2; padded class lanes carry a -1e30 bias so they contribute
        # nothing to the softmax normalizer.
        logits = jnp.dot(a1, w2f_ref[...],
                         preferred_element_type=f32) + b2f_ref[...]

        # log_softmax along the class (lane) dimension.
        m = jnp.max(logits, axis=1, keepdims=True)
        lse = jnp.log(jnp.sum(jnp.exp(logits - m), axis=1, keepdims=True)) + m
        o_ref[...] = logits - lse

    return kernel


# ------------------------------- parameters --------------------------------

def init_params(key, input_features, n_classes):
    feat = 64 * (input_features // 2 // 2)
    ks = jax.random.split(key, 19)

    def nrm(k, shape, scale):
        return (scale * jax.random.normal(k, shape)).astype(jnp.float32)

    return dict(
        conv1_w=nrm(ks[0], (32, 1, 3), 0.4),          # (Cout, Cin, K); kW=1 dropped
        conv1_b=nrm(ks[1], (32,), 0.1),
        bn1_gamma=(1.0 + 0.1 * jax.random.normal(ks[2], (32,))).astype(jnp.float32),
        bn1_beta=nrm(ks[3], (32,), 0.1),
        bn1_mean=nrm(ks[4], (32,), 0.1),
        bn1_var=(1.0 + 0.1 * jnp.abs(jax.random.normal(ks[5], (32,)))).astype(jnp.float32),
        conv2_w=nrm(ks[6], (64, 32, 3), 0.1),
        conv2_b=nrm(ks[7], (64,), 0.1),
        bn2_gamma=(1.0 + 0.1 * jax.random.normal(ks[8], (64,))).astype(jnp.float32),
        bn2_beta=nrm(ks[9], (64,), 0.1),
        bn2_mean=nrm(ks[10], (64,), 0.1),
        bn2_var=(1.0 + 0.1 * jnp.abs(jax.random.normal(ks[11], (64,)))).astype(jnp.float32),
        gru_w_ih=nrm(ks[12], (3 * HIDDEN, feat), feat ** -0.5),   # [W_ir; W_iz; W_in]
        gru_b_ih=nrm(ks[13], (3 * HIDDEN,), 0.05),
        gru_b_hh=nrm(ks[14], (3 * HIDDEN,), 0.05),
        # gru weight_hh never contributes: seq_len == 1 and h0 == 0.
        fc1_w=nrm(ks[15], (FC1, HIDDEN), HIDDEN ** -0.5),
        fc1_b=nrm(ks[16], (FC1,), 0.05),
        fc2_w=nrm(ks[17], (n_classes, FC1), FC1 ** -0.5),
        fc2_b=nrm(ks[18], (n_classes,), 0.05),
    )


def prepare_kernel_params(p, input_features, n_classes):
    H2 = input_features // 4
    Q = (H2 + 1) // 2
    assert n_classes <= CP

    # conv1 (Cin=1): fold the 3 taps into the 8 input lanes (im2col weight).
    w1t = jnp.zeros((TAPS, CP), jnp.float32)
    w1t = w1t.at[0:3, 0:32].set(jnp.transpose(p['conv1_w'][:, 0, :]))  # (3,32)

    # conv2: (Cout, Cin, K) -> (K, Cin_pad, Cout_pad); k=0 <-> tap h-1.
    w2k = jnp.transpose(p['conv2_w'], (2, 1, 0))
    w2k = jnp.pad(w2k, ((0, 0), (0, CP - 32), (0, CP - 64)))

    def fold_bn(gamma, beta, mean, var, conv_b):
        scale = gamma / jnp.sqrt(var + BN_EPS)
        shift = scale * (conv_b - mean) + beta
        c = scale.shape[0]
        return (jnp.pad(scale, (0, CP - c))[None, :],
                jnp.pad(shift, (0, CP - c))[None, :])

    s1, t1 = fold_bn(p['bn1_gamma'], p['bn1_beta'], p['bn1_mean'],
                     p['bn1_var'], p['conv1_b'])
    s2, t2 = fold_bn(p['bn2_gamma'], p['bn2_beta'], p['bn2_mean'],
                     p['bn2_var'], p['conv2_b'])

    # GRU input weight: fold the PyTorch NCHW flatten order (c*H2 + h') AND
    # pack h'-pairs into the 128 lanes (no 64->128 zero padding):
    #   wih[q*128 + tap*64 + c, g] = W_ih[g, c*H2 + (2q + tap)]
    w_ih = p['gru_w_ih']                                                # (3H, 64*H2)
    w_r = jnp.transpose(w_ih.reshape(3 * HIDDEN, 64, H2), (2, 1, 0))    # (H2, 64, 3H)
    w_r = jnp.pad(w_r, ((0, 2 * Q - H2), (0, 0), (0, 0)))               # odd H2 -> zero block
    wih = w_r.reshape(Q, 2 * 64, 3 * HIDDEN).reshape(Q * CP, 3 * HIDDEN)

    # gate biases: b_hh folds into b_ih for r,z; the n-gate keeps b_hh separate.
    bg = jnp.concatenate([p['gru_b_ih'][:2 * HIDDEN] + p['gru_b_hh'][:2 * HIDDEN],
                          p['gru_b_ih'][2 * HIDDEN:]])[None, :]
    bhn = p['gru_b_hh'][2 * HIDDEN:][None, :]

    w2f = jnp.pad(p['fc2_w'].T, ((0, 0), (0, CP - n_classes)))
    b2f = jnp.pad(p['fc2_b'], (0, CP - n_classes), constant_values=-1e30)[None, :]

    return dict(
        w1t=w1t, s1=s1, t1=t1,
        w2k=w2k, s2=s2, t2=t2,
        wih=wih, bg=bg, bhn=bhn,
        w1f=p['fc1_w'].T, b1f=p['fc1_b'][None, :],
        w2f=w2f, b2f=b2f,
    )


# --------------------------------- forward ---------------------------------

def forward(x_nchw, kp, n_classes):
    B, cin, H, W = x_nchw.shape
    assert cin == 1 and W == 1, "module expects NCHW input of shape (B, 1, H, 1)"
    assert H % 4 == 0 and H >= 4, "input_features must be divisible by 4"
    H1, H2 = H // 2, H // 4
    Q = (H2 + 1) // 2

    gB = _pick_group(B, H)                  # batches per grid step (8-aligned)
    B_pad = _round_up(B, gB)
    G = B_pad // gB

    # Input: im2col conv1's 3 taps into 8 lanes, rows ordered m = h*gB + b.
    # Only 8 f32 lanes per row -> 16x less input DMA than a 128-lane pad.
    xsq = jnp.pad(x_nchw.reshape(B, H).astype(jnp.float32),
                  ((0, B_pad - B), (0, 0)))
    zcol = jnp.zeros((B_pad, 1), jnp.float32)
    taps = jnp.stack([jnp.concatenate([zcol, xsq[:, :-1]], axis=1),   # x[h-1]
                      xsq,                                            # x[h]
                      jnp.concatenate([xsq[:, 1:], zcol], axis=1)],   # x[h+1]
                     axis=-1)                                         # (B_pad,H,3)
    taps = jnp.pad(taps, ((0, 0), (0, 0), (0, TAPS - 3)))
    x_taps = jnp.transpose(taps.reshape(G, gB, H, TAPS),
                           (0, 2, 1, 3)).reshape(G, H * gB, TAPS)

    operands = [x_taps, kp['w1t'], kp['s1'], kp['t1'], kp['w2k'], kp['s2'],
                kp['t2'], kp['wih'], kp['bg'], kp['bhn'], kp['w1f'], kp['b1f'],
                kp['w2f'], kp['b2f']]

    def _bcast_spec(a):                     # weights: same block every group
        zeros = (0,) * a.ndim
        return pl.BlockSpec(a.shape, lambda g, _z=zeros: _z)

    in_specs = ([pl.BlockSpec((None, H * gB, TAPS), lambda g: (g, 0, 0))]
                + [_bcast_spec(a) for a in operands[1:]])
    out_specs = pl.BlockSpec((None, gB, CP), lambda g: (g, 0, 0))

    scratch_shapes = [pltpu.VMEM((H1 * gB, CP), jnp.float32),     # conv2 acc
                      pltpu.VMEM((Q * gB, CP), jnp.float32),      # packed p2
                      pltpu.VMEM((gB, 3 * HIDDEN), jnp.float32)]  # GRU gates

    # Explicit VMEM limit (default scoped limit is 32 MiB): activation slabs +
    # double-buffered weights/IO + headroom, clamped to v7x's 64 MiB physical.
    weight_bytes = sum(int(a.size) * 4 for a in operands[1:])
    act_bytes = 4 * CP * (H * gB + 2 * H1 * gB + Q * gB + 4 * gB)
    io_bytes = 2 * 4 * (H * gB * TAPS + gB * CP)
    vmem_limit = int(min(max(2 * weight_bytes + 2 * act_bytes + io_bytes
                             + (8 << 20), 32 << 20), 64 << 20))

    flops = G * 2 * (H * gB * TAPS * CP            # conv1
                     + 3 * H1 * gB * CP * CP       # conv2
                     + Q * gB * CP * 3 * HIDDEN    # GRU input projection
                     + gB * HIDDEN * FC1           # fc1
                     + gB * FC1 * CP)              # fc2
    transcendentals = G * gB * (3 * HIDDEN + CP)
    bytes_accessed = 4 * (int(x_taps.size) + weight_bytes // 4 + G * gB * CP)

    out = pl.pallas_call(
        _make_fused_kernel(gB, H, Q),
        out_shape=jax.ShapeDtypeStruct((G, gB, CP), jnp.float32),
        grid=(G,),
        in_specs=in_specs,
        out_specs=out_specs,
        scratch_shapes=scratch_shapes,
        compiler_params=pltpu.CompilerParams(
            dimension_semantics=("parallel",),
            vmem_limit_bytes=vmem_limit),
        cost_estimate=pl.CostEstimate(flops=int(flops),
                                      transcendentals=int(transcendentals),
                                      bytes_accessed=int(bytes_accessed)),
    )(*operands)

    return out.reshape(G * gB, CP)[:B, :n_classes]


# -------------------------- pure-JAX reference -----------------------------

def reference_forward(x_nchw, p):
    """Straightforward (non-Pallas) forward used only to validate the kernel."""
    B = x_nchw.shape[0]
    x = x_nchw[:, 0, :, 0][..., None]                   # (B, H, 1) channels-last

    def block(a, w, b, gamma, beta, mean, var):
        Bb, Hs, _ = a.shape
        ap = jnp.pad(a, ((0, 0), (1, 1), (0, 0)))
        y = b[None, None, :].astype(jnp.float32)
        for k in range(3):
            y = y + jnp.einsum('bhc,oc->bho', ap[:, k:k + Hs, :], w[:, :, k])
        y = gamma * (y - mean) / jnp.sqrt(var + BN_EPS) + beta
        y = jnp.maximum(y, 0.0)
        return jnp.maximum(y[:, 0::2, :], y[:, 1::2, :])

    y1 = block(x, p['conv1_w'], p['conv1_b'],
               p['bn1_gamma'], p['bn1_beta'], p['bn1_mean'], p['bn1_var'])
    y2 = block(y1, p['conv2_w'], p['conv2_b'],
               p['bn2_gamma'], p['bn2_beta'], p['bn2_mean'], p['bn2_var'])
    feat = jnp.transpose(y2, (0, 2, 1)).reshape(B, -1)  # PyTorch NCHW flatten

    gi = feat @ p['gru_w_ih'].T + p['gru_b_ih']
    gh = p['gru_b_hh']
    r = jax.nn.sigmoid(gi[:, :HIDDEN] + gh[:HIDDEN])
    z = jax.nn.sigmoid(gi[:, HIDDEN:2 * HIDDEN] + gh[HIDDEN:2 * HIDDEN])
    n = jnp.tanh(gi[:, 2 * HIDDEN:] + r * gh[2 * HIDDEN:])
    h = (1.0 - z) * n

    a1 = jnp.maximum(h @ p['fc1_w'].T + p['fc1_b'], 0.0)
    logits = a1 @ p['fc2_w'].T + p['fc2_b']
    return jax.nn.log_softmax(logits, axis=-1)


# ----------------------------------- main -----------------------------------

if __name__ == "__main__":
    key = jax.random.PRNGKey(0)
    B, input_features, n_classes = 2, 16, 10
    kx, kparam = jax.random.split(key)

    # PyTorch-style NCHW input: (batch, 1 channel, input_features, 1)
    x = jax.random.normal(kx, (B, 1, input_features, 1), jnp.float32)

    params = init_params(kparam, input_features, n_classes)
    kp = prepare_kernel_params(params, input_features, n_classes)

    fwd = jax.jit(functools.partial(forward, n_classes=n_classes))
    out = jax.block_until_ready(fwd(x, kp))

    assert out.shape == (B, n_classes)
    # log_softmax rows must exponentiate-sum to 1
    assert bool(jnp.allclose(jnp.exp(out).sum(axis=1), 1.0, atol=1e-3))
    # cross-check against a pure-JAX reference of the PyTorch module
    with jax.default_matmul_precision("highest"):
        ref = jax.block_until_ready(reference_forward(x, params))
    assert bool(jnp.allclose(out, ref, atol=2e-2, rtol=2e-2)), (
        "max |out-ref| = %g" % float(jnp.max(jnp.abs(out - ref))))
    print("KERNEL_OK")
</pallas_src>

<mosaic_0001>
module attributes {stable_mosaic.version = 11 : i64} {
  func.func @kernel(%arg0: i32, %arg1: memref<1x128x8xf32, #tpu.memory_space<vmem>>, %arg2: memref<8x128xf32, #tpu.memory_space<vmem>>, %arg3: memref<1x128xf32, #tpu.memory_space<vmem>>, %arg4: memref<1x128xf32, #tpu.memory_space<vmem>>, %arg5: memref<3x128x128xf32, #tpu.memory_space<vmem>>, %arg6: memref<1x128xf32, #tpu.memory_space<vmem>>, %arg7: memref<1x128xf32, #tpu.memory_space<vmem>>, %arg8: memref<256x384xf32, #tpu.memory_space<vmem>>, %arg9: memref<1x384xf32, #tpu.memory_space<vmem>>, %arg10: memref<1x128xf32, #tpu.memory_space<vmem>>, %arg11: memref<128x256xf32, #tpu.memory_space<vmem>>, %arg12: memref<1x256xf32, #tpu.memory_space<vmem>>, %arg13: memref<256x128xf32, #tpu.memory_space<vmem>>, %arg14: memref<1x128xf32, #tpu.memory_space<vmem>>, %arg15: memref<1x8x128xf32, #tpu.memory_space<vmem>>, %arg16: memref<64x128xf32, #tpu.memory_space<vmem>>, %arg17: memref<16x128xf32, #tpu.memory_space<vmem>>, %arg18: memref<8x384xf32, #tpu.memory_space<vmem>>) attributes {dimension_semantics = [#tpu.dimension_semantics<parallel>], iteration_bounds = array<i64: 1>, scalar_prefetch = 0 : i64, scratch_operands = 3 : i64, tpu.core_type = #tpu.core_type<tc>, window_params = [{transform_indices = @transform_0, window_bounds = array<i64: 1, 128, 8>}, {pipeline_mode = #tpu.pipeline_mode<synchronous>, transform_indices = @transform_1, window_bounds = array<i64: 8, 128>}, {pipeline_mode = #tpu.pipeline_mode<synchronous>, transform_indices = @transform_2, window_bounds = array<i64: 1, 128>}, {pipeline_mode = #tpu.pipeline_mode<synchronous>, transform_indices = @transform_3, window_bounds = array<i64: 1, 128>}, {pipeline_mode = #tpu.pipeline_mode<synchronous>, transform_indices = @transform_4, window_bounds = array<i64: 3, 128, 128>}, {pipeline_mode = #tpu.pipeline_mode<synchronous>, transform_indices = @transform_5, window_bounds = array<i64: 1, 128>}, {pipeline_mode = #tpu.pipeline_mode<synchronous>, transform_indices = @transform_6, window_bounds = array<i64: 1, 128>}, {pipeline_mode = #tpu.pipeline_mode<synchronous>, transform_indices = @transform_7, window_bounds = array<i64: 256, 384>}, {pipeline_mode = #tpu.pipeline_mode<synchronous>, transform_indices = @transform_8, window_bounds = array<i64: 1, 384>}, {pipeline_mode = #tpu.pipeline_mode<synchronous>, transform_indices = @transform_9, window_bounds = array<i64: 1, 128>}, {pipeline_mode = #tpu.pipeline_mode<synchronous>, transform_indices = @transform_10, window_bounds = array<i64: 128, 256>}, {pipeline_mode = #tpu.pipeline_mode<synchronous>, transform_indices = @transform_11, window_bounds = array<i64: 1, 256>}, {pipeline_mode = #tpu.pipeline_mode<synchronous>, transform_indices = @transform_12, window_bounds = array<i64: 256, 128>}, {pipeline_mode = #tpu.pipeline_mode<synchronous>, transform_indices = @transform_13, window_bounds = array<i64: 1, 128>}, {transform_indices = @transform_14, window_bounds = array<i64: 1, 8, 128>}]} {
    %c0 = arith.constant 0 : index
    %c0_0 = arith.constant 0 : index
    %c0_1 = arith.constant 0 : index
    %0 = vector.load %arg1[%c0, %c0_0, %c0_1] : memref<1x128x8xf32, #tpu.memory_space<vmem>>, vector<1x128x8xf32>
    %1 = vector.shape_cast %0 : vector<1x128x8xf32> to vector<128x8xf32>
    %c0_2 = arith.constant 0 : index
    %c0_3 = arith.constant 0 : index
    %2 = vector.load %arg2[%c0_2, %c0_3] : memref<8x128xf32, #tpu.memory_space<vmem>>, vector<8x128xf32>
    %cst = arith.constant dense<0.000000e+00> : vector<128x128xf32>
    %3 = tpu.matmul %1, %2, %cst {dimension_numbers = #tpu.dot_dimension_numbers<[1], [0], [0], [1], [0, 0, 1, 1], [], []>} : vector<128x8xf32>, vector<8x128xf32>, vector<128x128xf32> -> vector<128x128xf32>
    %c0_4 = arith.constant 0 : index
    %c0_5 = arith.constant 0 : index
    %4 = vector.load %arg3[%c0_4, %c0_5] : memref<1x128xf32, #tpu.memory_space<vmem>>, vector<1x128xf32>
    %5 = vector.broadcast %4 : vector<1x128xf32> to vector<128x128xf32>
    %6 = arith.mulf %3, %5 : vector<128x128xf32>
    %c0_6 = arith.constant 0 : index
    %c0_7 = arith.constant 0 : index
    %7 = vector.load %arg4[%c0_6, %c0_7] : memref<1x128xf32, #tpu.memory_space<vmem>>, vector<1x128xf32>
    %8 = vector.broadcast %7 : vector<1x128xf32> to vector<128x128xf32>
    %9 = arith.addf %6, %8 : vector<128x128xf32>
    %cst_8 = arith.constant 0.000000e+00 : f32
    %10 = vector.broadcast %cst_8 : f32 to vector<128x128xf32>
    %11 = arith.maximumf %9, %10 : vector<128x128xf32>
    %12 = vector.shape_cast %11 : vector<128x128xf32> to vector<8x16x128xf32>
    %13 = vector.extract_strided_slice %12 {offsets = [0, 0, 0], sizes = [8, 8, 128], strides = [1, 1, 1]} : vector<8x16x128xf32> to vector<8x8x128xf32>
    %14 = vector.extract_strided_slice %12 {offsets = [0, 8, 0], sizes = [8, 8, 128], strides = [1, 1, 1]} : vector<8x16x128xf32> to vector<8x8x128xf32>
    %15 = arith.maximumf %13, %14 : vector<8x8x128xf32>
    %16 = vector.shape_cast %15 : vector<8x8x128xf32> to vector<64x128xf32>
    %c1 = arith.constant 1 : index
    %c0_9 = arith.constant 0 : index
    %c0_10 = arith.constant 0 : index
    %17 = vector.load %arg5[%c1, %c0_9, %c0_10] : memref<3x128x128xf32, #tpu.memory_space<vmem>>, vector<1x128x128xf32>
    %18 = vector.shape_cast %17 : vector<1x128x128xf32> to vector<128x128xf32>
    %cst_11 = arith.constant dense<0.000000e+00> : vector<64x128xf32>
    %19 = tpu.matmul %16, %18, %cst_11 {dimension_numbers = #tpu.dot_dimension_numbers<[1], [0], [0], [1], [0, 0, 1, 1], [], []>} : vector<64x128xf32>, vector<128x128xf32>, vector<64x128xf32> -> vector<64x128xf32>
    %c0_12 = arith.constant 0 : index
    %c0_13 = arith.constant 0 : index
    %20 = vector.load %arg16[%c0_12, %c0_13] : memref<64x128xf32, #tpu.memory_space<vmem>>, vector<64x128xf32>
    tpu.vector_store %arg16[%c0_12, %c0_13], %19 {strides = array<i32>} : memref<64x128xf32, #tpu.memory_space<vmem>>, vector<64x128xf32>,
    %c8 = arith.constant 8 : index
    %c0_14 = arith.constant 0 : index
    %21 = vector.load %arg16[%c8, %c0_14] : memref<64x128xf32, #tpu.memory_space<vmem>>, vector<56x128xf32>
    %22 = vector.extract_strided_slice %16 {offsets = [0, 0], sizes = [56, 128], strides = [1, 1]} : vector<64x128xf32> to vector<56x128xf32>
    %c0_15 = arith.constant 0 : index
    %c0_16 = arith.constant 0 : index
    %c0_17 = arith.constant 0 : index
    %23 = vector.load %arg5[%c0_15, %c0_16, %c0_17] : memref<3x128x128xf32, #tpu.memory_space<vmem>>, vector<1x128x128xf32>
    %24 = vector.shape_cast %23 : vector<1x128x128xf32> to vector<128x128xf32>
    %cst_18 = arith.constant dense<0.000000e+00> : vector<56x128xf32>
    %25 = tpu.matmul %22, %24, %cst_18 {dimension_numbers = #tpu.dot_dimension_numbers<[1], [0], [0], [1], [0, 0, 1, 1], [], []>} : vector<56x128xf32>, vector<128x128xf32>, vector<56x128xf32> -> vector<56x128xf32>
    %26 = arith.addf %21, %25 : vector<56x128xf32>
    %c8_19 = arith.constant 8 : index
    %c0_20 = arith.constant 0 : index
    %27 = vector.load %arg16[%c8_19, %c0_20] : memref<64x128xf32, #tpu.memory_space<vmem>>, vector<56x128xf32>
    tpu.vector_store %arg16[%c8_19, %c0_20], %26 {strides = array<i32>} : memref<64x128xf32, #tpu.memory_space<vmem>>, vector<56x128xf32>,
    %c0_21 = arith.constant 0 : index
    %c0_22 = arith.constant 0 : index
    %28 = vector.load %arg16[%c0_21, %c0_22] : memref<64x128xf32, #tpu.memory_space<vmem>>, vector<56x128xf32>
    %29 = vector.extract_strided_slice %16 {offsets = [8, 0], sizes = [56, 128], strides = [1, 1]} : vector<64x128xf32> to vector<56x128xf32>
    %c2 = arith.constant 2 : index
    %c0_23 = arith.constant 0 : index
    %c0_24 = arith.constant 0 : index
    %30 = vector.load %arg5[%c2, %c0_23, %c0_24] : memref<3x128x128xf32, #tpu.memory_space<vmem>>, vector<1x128x128xf32>
    %31 = vector.shape_cast %30 : vector<1x128x128xf32> to vector<128x128xf32>
    %cst_25 = arith.constant dense<0.000000e+00> : vector<56x128xf32>
    %32 = tpu.matmul %29, %31, %cst_25 {dimension_numbers = #tpu.dot_dimension_numbers<[1], [0], [0], [1], [0, 0, 1, 1], [], []>} : vector<56x128xf32>, vector<128x128xf32>, vector<56x128xf32> -> vector<56x128xf32>
    %33 = arith.addf %28, %32 : vector<56x128xf32>
    %c0_26 = arith.constant 0 : index
    %c0_27 = arith.constant 0 : index
    %34 = vector.load %arg16[%c0_26, %c0_27] : memref<64x128xf32, #tpu.memory_space<vmem>>, vector<56x128xf32>
    tpu.vector_store %arg16[%c0_26, %c0_27], %33 {strides = array<i32>} : memref<64x128xf32, #tpu.memory_space<vmem>>, vector<56x128xf32>,
    %c0_28 = arith.constant 0 : index
    %c0_29 = arith.constant 0 : index
    %35 = vector.load %arg16[%c0_28, %c0_29] : memref<64x128xf32, #tpu.memory_space<vmem>>, vector<64x128xf32>
    %c0_30 = arith.constant 0 : index
    %c0_31 = arith.constant 0 : index
    %36 = vector.load %arg6[%c0_30, %c0_31] : memref<1x128xf32, #tpu.memory_space<vmem>>, vector<1x128xf32>
    %37 = vector.broadcast %36 : vector<1x128xf32> to vector<64x128xf32>
    %38 = arith.mulf %35, %37 : vector<64x128xf32>
    %c0_32 = arith.constant 0 : index
    %c0_33 = arith.constant 0 : index
    %39 = vector.load %arg7[%c0_32, %c0_33] : memref<1x128xf32, #tpu.memory_space<vmem>>, vector<1x128xf32>
    %40 = vector.broadcast %39 : vector<1x128xf32> to vector<64x128xf32>
    %41 = arith.addf %38, %40 : vector<64x128xf32>
    %cst_34 = arith.constant 0.000000e+00 : f32
    %42 = vector.broadcast %cst_34 : f32 to vector<64x128xf32>
    %43 = arith.maximumf %41, %42 : vector<64x128xf32>
    %44 = vector.shape_cast %43 : vector<64x128xf32> to vector<2x32x128xf32>
    %45 = vector.extract_strided_slice %44 {offsets = [0, 0, 0], sizes = [2, 8, 128], strides = [1, 1, 1]} : vector<2x32x128xf32> to vector<2x8x128xf32>
    %46 = vector.extract_strided_slice %44 {offsets = [0, 8, 0], sizes = [2, 8, 128], strides = [1, 1, 1]} : vector<2x32x128xf32> to vector<2x8x128xf32>
    %47 = arith.maximumf %45, %46 : vector<2x8x128xf32>
    %48 = vector.shape_cast %47 : vector<2x8x128xf32> to vector<16x128xf32>
    %49 = vector.extract_strided_slice %44 {offsets = [0, 16, 0], sizes = [2, 8, 128], strides = [1, 1, 1]} : vector<2x32x128xf32> to vector<2x8x128xf32>
    %50 = vector.extract_strided_slice %44 {offsets = [0, 24, 0], sizes = [2, 8, 128], strides = [1, 1, 1]} : vector<2x32x128xf32> to vector<2x8x128xf32>
    %51 = arith.maximumf %49, %50 : vector<2x8x128xf32>
    %52 = vector.shape_cast %51 : vector<2x8x128xf32> to vector<16x128xf32>
    %c64_i32 = arith.constant 64 : i32
    %53 = tpu.dynamic_rotate %52 by %c64_i32 dim 1 : vector<16x128xf32>, i32 -> vector<16x128xf32>
    %54 = arith.addf %48, %53 : vector<16x128xf32>
    %c0_35 = arith.constant 0 : index
    %c0_36 = arith.constant 0 : index
    %55 = vector.load %arg17[%c0_35, %c0_36] : memref<16x128xf32, #tpu.memory_space<vmem>>, vector<16x128xf32>
    tpu.vector_store %arg17[%c0_35, %c0_36], %54 {strides = array<i32>} : memref<16x128xf32, #tpu.memory_space<vmem>>, vector<16x128xf32>,
    %cst_37 = arith.constant 0.000000e+00 : f32
    %56 = vector.broadcast %cst_37 : f32 to vector<8x384xf32>
    %c0_38 = arith.constant 0 : index
    %c0_39 = arith.constant 0 : index
    %57 = vector.load %arg18[%c0_38, %c0_39] : memref<8x384xf32, #tpu.memory_space<vmem>>, vector<8x384xf32>
    tpu.vector_store %arg18[%c0_38, %c0_39], %56 {strides = array<i32>} : memref<8x384xf32, #tpu.memory_space<vmem>>, vector<8x384xf32>,
    %c0_i32 = arith.constant 0 : i32
    %c8_i32 = arith.constant 8 : i32
    %58 = arith.muli %c0_i32, %c8_i32 : i32
    %59 = tpu.assume_multiple %58, 8 : i32
    %c128_i32 = arith.constant 128 : i32
    %60 = arith.muli %c0_i32, %c128_i32 : i32
    %61 = tpu.assume_multiple %60, 128 : i32
    %c0_40 = arith.constant 0 : index
    %c0_41 = arith.constant 0 : index
    %62 = vector.load %arg18[%c0_40, %c0_41] : memref<8x384xf32, #tpu.memory_space<vmem>>, vector<8x384xf32>
    %63 = arith.index_cast %59 : i32 to index
    %c0_42 = arith.constant 0 : index
    %64 = vector.load %arg17[%63, %c0_42] : memref<16x128xf32, #tpu.memory_space<vmem>>, vector<8x128xf32>
    %65 = arith.index_cast %61 : i32 to index
    %c0_43 = arith.constant 0 : index
    %66 = vector.load %arg8[%65, %c0_43] : memref<256x384xf32, #tpu.memory_space<vmem>>, vector<128x384xf32>
    %cst_44 = arith.constant dense<0.000000e+00> : vector<8x384xf32>
    %67 = tpu.matmul %64, %66, %cst_44 {dimension_numbers = #tpu.dot_dimension_numbers<[1], [0], [0], [1], [0, 0, 1, 1], [], []>} : vector<8x128xf32>, vector<128x384xf32>, vector<8x384xf32> -> vector<8x384xf32>
    %68 = arith.addf %62, %67 : vector<8x384xf32>
    %c0_45 = arith.constant 0 : index
    %c0_46 = arith.constant 0 : index
    %69 = vector.load %arg18[%c0_45, %c0_46] : memref<8x384xf32, #tpu.memory_space<vmem>>, vector<8x384xf32>
    tpu.vector_store %arg18[%c0_45, %c0_46], %68 {strides = array<i32>} : memref<8x384xf32, #tpu.memory_space<vmem>>, vector<8x384xf32>,
    %c1_i32 = arith.constant 1 : i32
    %c8_i32_47 = arith.constant 8 : i32
    %70 = arith.muli %c1_i32, %c8_i32_47 : i32
    %71 = tpu.assume_multiple %70, 8 : i32
    %c128_i32_48 = arith.constant 128 : i32
    %72 = arith.muli %c1_i32, %c128_i32_48 : i32
    %73 = tpu.assume_multiple %72, 128 : i32
    %c0_49 = arith.constant 0 : index
    %c0_50 = arith.constant 0 : index
    %74 = vector.load %arg18[%c0_49, %c0_50] : memref<8x384xf32, #tpu.memory_space<vmem>>, vector<8x384xf32>
    %75 = arith.index_cast %71 : i32 to index
    %c0_51 = arith.constant 0 : index
    %76 = vector.load %arg17[%75, %c0_51] : memref<16x128xf32, #tpu.memory_space<vmem>>, vector<8x128xf32>
    %77 = arith.index_cast %73 : i32 to index
    %c0_52 = arith.constant 0 : index
    %78 = vector.load %arg8[%77, %c0_52] : memref<256x384xf32, #tpu.memory_space<vmem>>, vector<128x384xf32>
    %cst_53 = arith.constant dense<0.000000e+00> : vector<8x384xf32>
    %79 = tpu.matmul %76, %78, %cst_53 {dimension_numbers = #tpu.dot_dimension_numbers<[1], [0], [0], [1], [0, 0, 1, 1], [], []>} : vector<8x128xf32>, vector<128x384xf32>, vector<8x384xf32> -> vector<8x384xf32>
    %80 = arith.addf %74, %79 : vector<8x384xf32>
    %c0_54 = arith.constant 0 : index
    %c0_55 = arith.constant 0 : index
    %81 = vector.load %arg18[%c0_54, %c0_55] : memref<8x384xf32, #tpu.memory_space<vmem>>, vector<8x384xf32>
    tpu.vector_store %arg18[%c0_54, %c0_55], %80 {strides = array<i32>} : memref<8x384xf32, #tpu.memory_space<vmem>>, vector<8x384xf32>,
    %c2_i32 = arith.constant 2 : i32
    %c0_56 = arith.constant 0 : index
    %c0_57 = arith.constant 0 : index
    %82 = vector.load %arg18[%c0_56, %c0_57] : memref<8x384xf32, #tpu.memory_space<vmem>>, vector<8x384xf32>
    %c0_58 = arith.constant 0 : index
    %c0_59 = arith.constant 0 : index
    %83 = vector.load %arg9[%c0_58, %c0_59] : memref<1x384xf32, #tpu.memory_space<vmem>>, vector<1x384xf32>
    %84 = vector.broadcast %83 : vector<1x384xf32> to vector<8x384xf32>
    %85 = arith.addf %82, %84 : vector<8x384xf32>
    %86 = vector.extract_strided_slice %85 {offsets = [0, 0], sizes = [8, 128], strides = [1, 1]} : vector<8x384xf32> to vector<8x128xf32>
    %cst_60 = arith.constant 5.000000e-01 : f32
    %87 = vector.broadcast %cst_60 : f32 to vector<8x128xf32>
    %88 = arith.mulf %87, %86 : vector<8x128xf32>
    %89 = math.tanh %88 : vector<8x128xf32>
    %cst_61 = arith.constant 1.000000e+00 : f32
    %90 = vector.broadcast %cst_61 : f32 to vector<8x128xf32>
    %91 = arith.addf %89, %90 : vector<8x128xf32>
    %cst_62 = arith.constant 5.000000e-01 : f32
    %92 = vector.broadcast %cst_62 : f32 to vector<8x128xf32>
    %93 = arith.mulf %92, %91 : vector<8x128xf32>
    %94 = vector.extract_strided_slice %85 {offsets = [0, 128], sizes = [8, 128], strides = [1, 1]} : vector<8x384xf32> to vector<8x128xf32>
    %cst_63 = arith.constant 5.000000e-01 : f32
    %95 = vector.broadcast %cst_63 : f32 to vector<8x128xf32>
    %96 = arith.mulf %95, %94 : vector<8x128xf32>
    %97 = math.tanh %96 : vector<8x128xf32>
    %cst_64 = arith.constant 1.000000e+00 : f32
    %98 = vector.broadcast %cst_64 : f32 to vector<8x128xf32>
    %99 = arith.addf %97, %98 : vector<8x128xf32>
    %cst_65 = arith.constant 5.000000e-01 : f32
    %100 = vector.broadcast %cst_65 : f32 to vector<8x128xf32>
    %101 = arith.mulf %100, %99 : vector<8x128xf32>
    %102 = vector.extract_strided_slice %85 {offsets = [0, 256], sizes = [8, 128], strides = [1, 1]} : vector<8x384xf32> to vector<8x128xf32>
    %c0_66 = arith.constant 0 : index
    %c0_67 = arith.constant 0 : index
    %103 = vector.load %arg10[%c0_66, %c0_67] : memref<1x128xf32, #tpu.memory_space<vmem>>, vector<1x128xf32>
    %104 = vector.broadcast %103 : vector<1x128xf32> to vector<8x128xf32>
    %105 = arith.mulf %93, %104 : vector<8x128xf32>
    %106 = arith.addf %102, %105 : vector<8x128xf32>
    %107 = math.tanh %106 : vector<8x128xf32>
    %cst_68 = arith.constant 1.000000e+00 : f32
    %108 = vector.broadcast %cst_68 : f32 to vector<8x128xf32>
    %109 = arith.subf %108, %101 : vector<8x128xf32>
    %110 = arith.mulf %109, %107 : vector<8x128xf32>
    %c0_69 = arith.constant 0 : index
    %c0_70 = arith.constant 0 : index
    %111 = vector.load %arg11[%c0_69, %c0_70] : memref<128x256xf32, #tpu.memory_space<vmem>>, vector<128x256xf32>
    %cst_71 = arith.constant dense<0.000000e+00> : vector<8x256xf32>
    %112 = tpu.matmul %110, %111, %cst_71 {dimension_numbers = #tpu.dot_dimension_numbers<[1], [0], [0], [1], [0, 0, 1, 1], [], []>} : vector<8x128xf32>, vector<128x256xf32>, vector<8x256xf32> -> vector<8x256xf32>
    %c0_72 = arith.constant 0 : index
    %c0_73 = arith.constant 0 : index
    %113 = vector.load %arg12[%c0_72, %c0_73] : memref<1x256xf32, #tpu.memory_space<vmem>>, vector<1x256xf32>
    %114 = vector.broadcast %113 : vector<1x256xf32> to vector<8x256xf32>
    %115 = arith.addf %112, %114 : vector<8x256xf32>
    %cst_74 = arith.constant 0.000000e+00 : f32
    %116 = vector.broadcast %cst_74 : f32 to vector<8x256xf32>
    %117 = arith.maximumf %115, %116 : vector<8x256xf32>
    %c0_75 = arith.constant 0 : index
    %c0_76 = arith.constant 0 : index
    %118 = vector.load %arg13[%c0_75, %c0_76] : memref<256x128xf32, #tpu.memory_space<vmem>>, vector<256x128xf32>
    %cst_77 = arith.constant dense<0.000000e+00> : vector<8x128xf32>
    %119 = tpu.matmul %117, %118, %cst_77 {dimension_numbers = #tpu.dot_dimension_numbers<[1], [0], [0], [1], [0, 0, 1, 1], [], []>} : vector<8x256xf32>, vector<256x128xf32>, vector<8x128xf32> -> vector<8x128xf32>
    %c0_78 = arith.constant 0 : index
    %c0_79 = arith.constant 0 : index
    %120 = vector.load %arg14[%c0_78, %c0_79] : memref<1x128xf32, #tpu.memory_space<vmem>>, vector<1x128xf32>
    %121 = vector.broadcast %120 : vector<1x128xf32> to vector<8x128xf32>
    %122 = arith.addf %119, %121 : vector<8x128xf32>
    %cst_80 = arith.constant dense<0xFF800000> : vector<8xf32>
    %123 = vector.multi_reduction <maximumf>, %122, %cst_80 [1] : vector<8x128xf32> to vector<8xf32>
    %124 = vector.shape_cast %123 : vector<8xf32> to vector<8x1xf32>
    %125 = vector.broadcast %124 : vector<8x1xf32> to vector<8x128xf32>
    %126 = arith.subf %122, %125 : vector<8x128xf32>
    %127 = math.exp %126 : vector<8x128xf32>
    %cst_81 = arith.constant dense<0.000000e+00> : vector<8xf32>
    %128 = vector.multi_reduction <add>, %127, %cst_81 [1] : vector<8x128xf32> to vector<8xf32>
    %129 = vector.shape_cast %128 : vector<8xf32> to vector<8x1xf32>
    %130 = math.log %129 : vector<8x1xf32>
    %131 = arith.addf %130, %124 : vector<8x1xf32>
    %132 = vector.broadcast %131 : vector<8x1xf32> to vector<8x128xf32>
    %133 = arith.subf %122, %132 : vector<8x128xf32>
    %c0_82 = arith.constant 0 : index
    %c0_83 = arith.constant 0 : index
    %c0_84 = arith.constant 0 : index
    %134 = vector.load %arg15[%c0_82, %c0_83, %c0_84] : memref<1x8x128xf32, #tpu.memory_space<vmem>>, vector<1x8x128xf32>
    %135 = vector.shape_cast %134 : vector<1x8x128xf32> to vector<8x128xf32>
    %136 = vector.shape_cast %133 : vector<8x128xf32> to vector<1x8x128xf32>
    tpu.vector_store %arg15[%c0_82, %c0_83, %c0_84], %136 {strides = array<i32>} : memref<1x8x128xf32, #tpu.memory_space<vmem>>, vector<1x8x128xf32>,
    return
  }
  func.func @transform_0(%arg0: i32) -> (i32, i32, i32) {
    %c0_i32 = arith.constant 0 : i32
    %c0_i32_0 = arith.constant 0 : i32
    %c0_i32_1 = arith.constant 0 : i32
    return %arg0, %c0_i32, %c0_i32_0 : i32, i32, i32
  }
  func.func @transform_1(%arg0: i32) -> (i32, i32) {
    %c0_i32 = arith.constant 0 : i32
    %c0_i32_0 = arith.constant 0 : i32
    %c0_i32_1 = arith.constant 0 : i32
    return %c0_i32, %c0_i32_0 : i32, i32
  }
  func.func @transform_2(%arg0: i32) -> (i32, i32) {
    %c0_i32 = arith.constant 0 : i32
    %c0_i32_0 = arith.constant 0 : i32
    %c0_i32_1 = arith.constant 0 : i32
    return %c0_i32, %c0_i32_0 : i32, i32
  }
  func.func @transform_3(%arg0: i32) -> (i32, i32) {
    %c0_i32 = arith.constant 0 : i32
    %c0_i32_0 = arith.constant 0 : i32
    %c0_i32_1 = arith.constant 0 : i32
    return %c0_i32, %c0_i32_0 : i32, i32
  }
  func.func @transform_4(%arg0: i32) -> (i32, i32, i32) {
    %c0_i32 = arith.constant 0 : i32
    %c0_i32_0 = arith.constant 0 : i32
    %c0_i32_1 = arith.constant 0 : i32
    %c0_i32_2 = arith.constant 0 : i32
    return %c0_i32, %c0_i32_0, %c0_i32_1 : i32, i32, i32
  }
  func.func @transform_5(%arg0: i32) -> (i32, i32) {
    %c0_i32 = arith.constant 0 : i32
    %c0_i32_0 = arith.constant 0 : i32
    %c0_i32_1 = arith.constant 0 : i32
    return %c0_i32, %c0_i32_0 : i32, i32
  }
  func.func @transform_6(%arg0: i32) -> (i32, i32) {
    %c0_i32 = arith.constant 0 : i32
    %c0_i32_0 = arith.constant 0 : i32
    %c0_i32_1 = arith.constant 0 : i32
    return %c0_i32, %c0_i32_0 : i32, i32
  }
  func.func @transform_7(%arg0: i32) -> (i32, i32) {
    %c0_i32 = arith.constant 0 : i32
    %c0_i32_0 = arith.constant 0 : i32
    %c0_i32_1 = arith.constant 0 : i32
    return %c0_i32, %c0_i32_0 : i32, i32
  }
  func.func @transform_8(%arg0: i32) -> (i32, i32) {
    %c0_i32 = arith.constant 0 : i32
    %c0_i32_0 = arith.constant 0 : i32
    %c0_i32_1 = arith.constant 0 : i32
    return %c0_i32, %c0_i32_0 : i32, i32
  }
  func.func @transform_9(%arg0: i32) -> (i32, i32) {
    %c0_i32 = arith.constant 0 : i32
    %c0_i32_0 = arith.constant 0 : i32
    %c0_i32_1 = arith.constant 0 : i32
    return %c0_i32, %c0_i32_0 : i32, i32
  }
  func.func @transform_10(%arg0: i32) -> (i32, i32) {
    %c0_i32 = arith.constant 0 : i32
    %c0_i32_0 = arith.constant 0 : i32
    %c0_i32_1 = arith.constant 0 : i32
    return %c0_i32, %c0_i32_0 : i32, i32
  }
  func.func @transform_11(%arg0: i32) -> (i32, i32) {
    %c0_i32 = arith.constant 0 : i32
    %c0_i32_0 = arith.constant 0 : i32
    %c0_i32_1 = arith.constant 0 : i32
    return %c0_i32, %c0_i32_0 : i32, i32
  }
  func.func @transform_12(%arg0: i32) -> (i32, i32) {
    %c0_i32 = arith.constant 0 : i32
    %c0_i32_0 = arith.constant 0 : i32
    %c0_i32_1 = arith.constant 0 : i32
    return %c0_i32, %c0_i32_0 : i32, i32
  }
  func.func @transform_13(%arg0: i32) -> (i32, i32) {
    %c0_i32 = arith.constant 0 : i32
    %c0_i32_0 = arith.constant 0 : i32
    %c0_i32_1 = arith.constant 0 : i32
    return %c0_i32, %c0_i32_0 : i32, i32
  }
  func.func @transform_14(%arg0: i32) -> (i32, i32, i32) {
    %c0_i32 = arith.constant 0 : i32
    %c0_i32_0 = arith.constant 0 : i32
    %c0_i32_1 = arith.constant 0 : i32
    return %arg0, %c0_i32, %c0_i32_0 : i32, i32, i32
  }
}

</mosaic_0001>

<bundles_post_ra>
// kernel: forward.1
= control target key start
LH: loop header
LB: loop body
LE: loop exit
PB: predicated region body
PF: predicated region fallthrough
CT: control target
= control target key end

     0   :  { %19 = vsyncpa [#allocation6], 0  ;;  %s1477_s0 = inlined_call_operand.vmem [shape: f32[1,128,8], index: 0, kind: input, shape index: {}]   ;;  %s1478_s1 = inlined_call_operand.vmem [shape: f32[8,128], index: 1, kind: input, shape index: {}]   ;;  %s1479_s2 = inlined_call_operand.vmem [shape: f32[1,128], index: 2, kind: input, shape index: {}]   ;;  %s1480_s3 = inlined_call_operand.vmem [shape: f32[1,128], index: 3, kind: input, shape index: {}]   ;;  %s1481_s4 = inlined_call_operand.hbm [shape: f32[3,128,128], index: 4, kind: input, shape index: {}]   ;;  %s1482_s5 = inlined_call_operand.vmem [shape: f32[1,128], index: 5, kind: input, shape index: {}]   ;;  %s1483_s6 = inlined_call_operand.vmem [shape: f32[1,128], index: 6, kind: input, shape index: {}]   ;;  %s1484_s7 = inlined_call_operand.hbm [shape: f32[256,384], index: 7, kind: input, shape index: {}]   ;;  %s1485_s8 = inlined_call_operand.vmem [shape: f32[1,384], index: 8, kind: input, shape index: {}]   ;;  %s1486_s9 = inlined_call_operand.vmem [shape: f32[1,128], index: 9, kind: input, shape index: {}]   ;;  %s1487_s10 = inlined_call_operand.vmem [shape: f32[128,256], index: 10, kind: input, shape index: {}]   ;;  %s1488_s11 = inlined_call_operand.vmem [shape: f32[1,256], index: 11, kind: input, shape index: {}]   ;;  %s1489_s12 = inlined_call_operand.hbm [shape: f32[256,128], index: 12, kind: input, shape index: {}]   ;;  %s1490_s13 = inlined_call_operand.vmem [shape: f32[1,128], index: 13, kind: input, shape index: {}]   ;;  %s1491_s14 = inlined_call_operand.vmem [shape: f32[1,8,128], index: 14, kind: output, shape index: {}]  }
   0x1   :  { %20 = vsyncpa [#allocation8], 0  ;;  %s50_s15 = sshll.u32 %s1484_s7, 4  ;;  %s1126_s16 = smov [#allocation7]   ;;  %s51_s15 = int_to_ptr.hbm [resolvable:$true] %s50_s15 }
   0x2   :  { %s52_s17 = sshll.u32 %s1126_s16, 4  ;;  %s33_s20 = sshll.u32 %s1481_s4, 4  ;;  %s53_s17 = int_to_ptr.vmem [resolvable:$true] %s52_s17  ;;  %s34_s20 = int_to_ptr.hbm [resolvable:$true] %s33_s20 }
   0x3   :  { %s1127_s21 = smov 384   ;;  %s1128_s22 = smov 24  }
   0x4   :  { %58 = dma.hbm_to_vmem [thread:$0]  %s51_s15, 12288, %s53_s17, [#allocation8], %s1127_s21, %s1127_s21, %s1128_s22  }
   0x5   :  { %s1129_s23 = smov [#allocation5]   ;;  %s1130_s25 = smov 128  }
   0x6   :  { %s35_s24 = sshll.u32 %s1129_s23, 4  ;;  %s1131_s26 = smov 8   ;;  %s36_s24 = int_to_ptr.vmem [resolvable:$true] %s35_s24 }
   0x7   :  { %41 = dma.hbm_to_vmem [thread:$0]  %s34_s20, 6144, %s36_s24, [#allocation6], %s1130_s25, %s1130_s25, %s1131_s26  }
   0x8   :  { %s71_s28 = sshll.u32 %s1489_s12, 4  ;;  %s1132_s29 = smov [#allocation9]   ;;  %s72_s28 = int_to_ptr.hbm [resolvable:$true] %s71_s28 }
   0x9   :  { %s73_s30 = sshll.u32 %s1132_s29, 4  ;;  %s74_s30 = int_to_ptr.vmem [resolvable:$true] %s73_s30 }
   0xa   :  { %79 = dma.hbm_to_vmem [thread:$0]  %s72_s28, 4096, %s74_s30, [#allocation8], %s1130_s25, %s1130_s25, %s1131_s26  }
   0xb   :  { %1122 = dma.done.wait [#allocation6], 6144  }
   0xc   :  { %1123 = vsyncadd [#allocation6], 4294961152 }
   0xd   :  { %1124 = dma.done.wait [#allocation8], 16384  }
   0xe   :  { %1125 = vsyncadd [#allocation8], 4294950912  ;;  %vm111_vm0 = vcmask 64512   ;;  %v110_v0 = vld [vmem:[%s1478_s1] sm:$0xff]  ;;  %v95_v2 = vld [vmem:[%s1477_s0 + $0x8] sm:$0xff] }
   0xf   :  { %v94_v1 = vld [vmem:[%s1477_s0] sm:$0xff]  ;;  %175 = vmatpush.msra.mxu0 %v110_v0  ;;  %v96_v3 = vld [vmem:[%s1477_s0 + $0x10] sm:$0xff]  ;;  %v97_v4 = vld [vmem:[%s1477_s0 + $0x18] sm:$0xff] }
  0x10   :  { %1010 = vmatmul.msk.f32.vlgmr.msra.gmra.mxu0 %vm111_vm0, %v94_v1  ;;  %v98_v5 = vld [vmem:[%s1477_s0 + $0x20] sm:$0xff]  ;;  %v99_v6 = vld [vmem:[%s1477_s0 + $0x28] sm:$0xff]  ;;  %v100_v7 = vld [vmem:[%s1477_s0 + $0x30] sm:$0xff] }
  0x11   :  { %v101_v8 = vld [vmem:[%s1477_s0 + $0x38] sm:$0xff]  ;;  %v102_v9 = vld [vmem:[%s1477_s0 + $0x40] sm:$0xff]  ;;  %v103_v10 = vld [vmem:[%s1477_s0 + $0x48] sm:$0xff] }
  0x12   :  { %v305_v11 = vld [vmem:[#allocation5 + $0xf8] sm:$0xff]  ;;  %v104_v13 = vld [vmem:[%s1477_s0 + $0x50] sm:$0xff]  ;;  %v303_v16 = vld [vmem:[#allocation5 + $0xe8] sm:$0xff] }
  0x13   :  { %v377_v12 = vld [vmem:[#allocation5 + $0x78] sm:$0xff]  ;;  %306 = vmatpush.msra.mxu1 %v305_v11  ;;  %v304_v14 = vld [vmem:[#allocation5 + $0xf0] sm:$0xff]  ;;  %v375_v17 = vld [vmem:[#allocation5 + $0x68] sm:$0xff] }
  0x14   :  { %378 = vmatpush.msra.mxu2 %v377_v12  ;;  %v376_v15 = vld [vmem:[#allocation5 + $0x70] sm:$0xff]  ;;  %v302_v18 = vld [vmem:[#allocation5 + $0xe0] sm:$0xff]  ;;  %v301_v20 = vld [vmem:[#allocation5 + $0xd8] sm:$0xff] }
  0x15   :  { %307 = vmatpush.msra.mxu1 %v304_v14  ;;  %v374_v19 = vld [vmem:[#allocation5 + $0x60] sm:$0xff]  ;;  %v373_v21 = vld [vmem:[#allocation5 + $0x58] sm:$0xff]  ;;  %v300_v23 = vld [vmem:[#allocation5 + $0xd0] sm:$0xff] }
  0x16   :  { %379 = vmatpush.msra.mxu2 %v376_v15  ;;  %v105_v22 = vld [vmem:[%s1477_s0 + $0x58] sm:$0xff]  ;;  %v372_v24 = vld [vmem:[#allocation5 + $0x50] sm:$0xff]  ;;  %v299_v25 = vld [vmem:[#allocation5 + $0xc8] sm:$0xff] }
  0x17   :  { %308 = vmatpush.msra.mxu1 %v303_v16  ;;  %v371_v26 = vld [vmem:[#allocation5 + $0x48] sm:$0xff]  ;;  %v298_v27 = vld [vmem:[#allocation5 + $0xc0] sm:$0xff]  ;;  %v297_v30 = vld [vmem:[#allocation5 + $0xb8] sm:$0xff] }
  0x18   :  { %1011 = vmatmul.msk.f32.gmra.mxu0 %vm111_vm0, %v95_v2  ;;  %380 = vmatpush.msra.mxu2 %v375_v17  ;;  %v370_v28 = vld [vmem:[#allocation5 + $0x40] sm:$0xff]  ;;  %v369_v31 = vld [vmem:[#allocation5 + $0x38] sm:$0xff]  ;;  %v296_v33 = vld [vmem:[#allocation5 + $0xb0] sm:$0xff] }
  0x19   :  { %309 = vmatpush.msra.mxu1 %v302_v18  ;;  %v106_v29 = vld [vmem:[%s1477_s0 + $0x60] sm:$0xff]  ;;  %v453_v32 = vld [vmem:[#allocation5 + $0x178] sm:$0xff]  ;;  %v368_v34 = vld [vmem:[#allocation5 + $0x30] sm:$0xff] }
  0x1a   :  { %381 = vmatpush.msra.mxu2 %v374_v19  ;;  %454 = vmatpush.msra.mxu3 %v453_v32  ;;  %v452_v35 = vld [vmem:[#allocation5 + $0x170] sm:$0xff]  ;;  %v295_v36 = vld [vmem:[#allocation5 + $0xa8] sm:$0xff]  ;;  %v294_v39 = vld [vmem:[#allocation5 + $0xa0] sm:$0xff] }
  0x1b   :  { %310 = vmatpush.msra.mxu1 %v301_v20  ;;  %v367_v37 = vld [vmem:[#allocation5 + $0x28] sm:$0xff]  ;;  %v366_v40 = vld [vmem:[#allocation5 + $0x20] sm:$0xff]  ;;  %v293_v43 = vld [vmem:[#allocation5 + $0x98] sm:$0xff] }
  0x1c   :  { %382 = vmatpush.msra.mxu2 %v373_v21  ;;  %455 = vmatpush.msra.mxu3 %v452_v35  ;;  %v451_v38 = vld [vmem:[#allocation5 + $0x168] sm:$0xff]  ;;  %v450_v41 = vld [vmem:[#allocation5 + $0x160] sm:$0xff]  ;;  %v365_v44 = vld [vmem:[#allocation5 + $0x18] sm:$0xff] }
  0x1d   :  { %311 = vmatpush.msra.mxu1 %v300_v23  ;;  %v107_v42 = vld [vmem:[%s1477_s0 + $0x68] sm:$0xff]  ;;  %v449_v45 = vld [vmem:[#allocation5 + $0x158] sm:$0xff]  ;;  %v292_v46 = vld [vmem:[#allocation5 + $0x90] sm:$0xff] }
  0x1e   :  { %383 = vmatpush.msra.mxu2 %v372_v24  ;;  %456 = vmatpush.msra.mxu3 %v451_v38  ;;  %v364_v47 = vld [vmem:[#allocation5 + $0x10] sm:$0xff]  ;;  %v291_v49 = vld [vmem:[#allocation5 + $0x88] sm:$0xff]  ;;  %v290_v52 = vld [vmem:[#allocation5 + $0x80] sm:$0xff] }
  0x1f   :  { %312 = vmatpush.msra.mxu1 %v299_v25  ;;  %v448_v48 = vld [vmem:[#allocation5 + $0x150] sm:$0xff]  ;;  %v363_v50 = vld [vmem:[#allocation5 + $0x8] sm:$0xff]  ;;  %v362_v53 = vld [vmem:[#allocation5] sm:$0xff] }
  0x20   :  { %1012 = vmatmul.msk.f32.gmra.mxu0 %vm111_vm0, %v96_v3  ;;  %384 = vmatpush.msra.mxu2 %v371_v26  ;;  %v447_v51 = vld [vmem:[#allocation5 + $0x148] sm:$0xff]  ;;  %v446_v54 = vld [vmem:[#allocation5 + $0x140] sm:$0xff]  ;;  %v108_v55 = vld [vmem:[%s1477_s0 + $0x70] sm:$0xff] }
  0x21   :  { %313 = vmatpush.msra.mxu1 %v298_v27  ;;  %457 = vmatpush.msra.mxu3 %v450_v41  ;;  %v445_v56 = vld [vmem:[#allocation5 + $0x138] sm:$0xff]  ;;  %v444_v57 = vld [vmem:[#allocation5 + $0x130] sm:$0xff]  ;;  %v443_v58 = vld [vmem:[#allocation5 + $0x128] sm:$0xff] }
  0x22   :  { %385 = vmatpush.msra.mxu2 %v370_v28  ;;  %v442_v59 = vld [vmem:[#allocation5 + $0x120] sm:$0xff]  ;;  %v109_v60 = vld [vmem:[%s1477_s0 + $0x78] sm:$0xff]  ;;  %v440_v62 = vld [vmem:[#allocation5 + $0x110] sm:$0xff] }
  0x23   :  { %314 = vmatpush.msra.mxu1 %v297_v30  ;;  %458 = vmatpush.msra.mxu3 %v449_v45  ;;  %v441_v61 = vld [vmem:[#allocation5 + $0x118] sm:$0xff]  ;;  %v439_v63 = vld [vmem:[#allocation5 + $0x108] sm:$0xff]  ;;  %v438_v0 = vld [vmem:[#allocation5 + $0x100] sm:$0xff] }
  0x24   :  { %386 = vmatpush.msra.mxu2 %v369_v31  ;;  %v1288_v2 = vld [vmem:[%s1479_s2] ss:$0 sm:$0xff] }
  0x25   :  { %315 = vmatpush.msra.mxu1 %v296_v33  ;;  %459 = vmatpush.msra.mxu3 %v448_v48 }
  0x26   :  { %387 = vmatpush.msra.mxu2 %v368_v34 }
  0x27   :  { %316 = vmatpush.msra.mxu1 %v295_v36  ;;  %460 = vmatpush.msra.mxu3 %v447_v51 }
  0x28   :  { %1013 = vmatmul.msk.f32.gmra.mxu0 %vm111_vm0, %v97_v4  ;;  %388 = vmatpush.msra.mxu2 %v367_v37  ;;  %v1294_v4 = vld [vmem:[%s1480_s3] ss:$0 sm:$0xff] }
  0x29   :  { %317 = vmatpush.msra.mxu1 %v294_v39  ;;  %461 = vmatpush.msra.mxu3 %v446_v54 }
  0x2a   :  { %389 = vmatpush.msra.mxu2 %v366_v40 }
  0x2b   :  { %318 = vmatpush.msra.mxu1 %v293_v43  ;;  %462 = vmatpush.msra.mxu3 %v445_v56 }
  0x2c   :  { %390 = vmatpush.msra.mxu2 %v365_v44 }
  0x2d   :  { %319 = vmatpush.msra.mxu1 %v292_v46  ;;  %463 = vmatpush.msra.mxu3 %v444_v57 }
  0x2e   :  { %391 = vmatpush.msra.mxu2 %v364_v47 }
  0x2f   :  { %320 = vmatpush.msra.mxu1 %v291_v49  ;;  %464 = vmatpush.msra.mxu3 %v443_v58 }
  0x30   :  { %1014 = vmatmul.msk.f32.gmra.mxu0 %vm111_vm0, %v98_v5  ;;  %392 = vmatpush.msra.mxu2 %v363_v50 }
  0x31   :  { %321 = vmatpush.msra.mxu1 %v290_v52  ;;  %465 = vmatpush.msra.mxu3 %v442_v59 }
  0x32   :  { %393 = vmatpush.msra.mxu2 %v362_v53 }
  0x33   :  { %466 = vmatpush.msra.mxu3 %v441_v61 }
  0x35   :  { %467 = vmatpush.msra.mxu3 %v440_v62 }
  0x37   :  { %468 = vmatpush.msra.mxu3 %v439_v63 }
  0x38   :  { %1015 = vmatmul.msk.f32.gmra.mxu0 %vm111_vm0, %v99_v6 }
  0x39   :  { %469 = vmatpush.msra.mxu3 %v438_v0 }
  0x40   :  { %1016 = vmatmul.msk.f32.gmra.mxu0 %vm111_vm0, %v100_v7 }
  0x48   :  { %1017 = vmatmul.msk.f32.gmra.mxu0 %vm111_vm0, %v101_v8 }
  0x50   :  { %1018 = vmatmul.msk.f32.gmra.mxu0 %vm111_vm0, %v102_v9 }
  0x58   :  { %1019 = vmatmul.msk.f32.gmra.mxu0 %vm111_vm0, %v103_v10 }
  0x60   :  { %1020 = vmatmul.msk.f32.gmra.mxu0 %vm111_vm0, %v104_v13 }
  0x68   :  { %1021 = vmatmul.msk.f32.gmra.mxu0 %vm111_vm0, %v105_v22 }
  0x70   :  { %1022 = vmatmul.msk.f32.gmra.mxu0 %vm111_vm0, %v106_v29 }
  0x78   :  { %1023 = vmatmul.msk.f32.gmra.mxu0 %vm111_vm0, %v107_v42 }
  0x80   :  { %1024 = vmatmul.msk.f32.gmra.mxu0 %vm111_vm0, %v108_v55 }
  0x88   :  { %1025 = vmatmul.msk.f32.gmra.mxu0 %vm111_vm0, %v109_v60 }
  0x8d   :  { %v177_v1 = vpop.f32.mrf.mxu0 }
  0x8e   :  { %v229_v3 = vmul.f32 %v1288_v2, %v177_v1 }
  0x90   :  { %v249_v6 = vadd.f32 %v1294_v4, %v229_v3 }
  0x92   :  { %v265_v9 = vmax.f32 %v249_v6, 0.0 }
  0x95   :  { %v180_v5 = vpop.f32.mrf.mxu0 }
  0x96   :  { %v230_v7 = vmul.f32 %v1288_v2, %v180_v5 }
  0x98   :  { %v250_v8 = vadd.f32 %v1294_v4, %v230_v7 }
  0x9a   :  { %v266_v10 = vmax.f32 %v250_v8, 0.0 }
  0x9c   :  { %v281_v11 = vmax.f32 %v265_v9, %v266_v10 }
  0x9d   :  { %v183_v12 = vpop.f32.mrf.mxu0 }
  0x9e   :  { %322 = vmatmul.f32.vlgmr.msra.gmra.mxu1 %v281_v11  ;;  %394 = vmatmul.f32.vlgmr.msra.gmra.mxu2 %v281_v11  ;;  %v231_v13 = vmul.f32 %v1288_v2, %v183_v12 }
  0xa0   :  { %v251_v15 = vadd.f32 %v1294_v4, %v231_v13 }
  0xa2   :  { %v267_v18 = vmax.f32 %v251_v15, 0.0 }
  0xa5   :  { %v186_v14 = vpop.f32.mrf.mxu0 }
  0xa6   :  { %v232_v16 = vmul.f32 %v1288_v2, %v186_v14 }
  0xa8   :  { %v252_v17 = vadd.f32 %v1294_v4, %v232_v16 }
  0xaa   :  { %v268_v19 = vmax.f32 %v252_v17, 0.0 }
  0xac   :  { %v282_v20 = vmax.f32 %v267_v18, %v268_v19  ;;  %v1330_v19 = vld [vmem:[%s1482_s5] ss:$0 sm:$0xff]  ;;  %s1133_s5 = smov 64  }
  0xad   :  { %v189_v21 = vpop.f32.mrf.mxu0 }
  0xae   :  { %325 = vmatmul.f32.gmra.mxu1 %v282_v20  ;;  %397 = vmatmul.f32.gmra.mxu2 %v282_v20  ;;  %v233_v22 = vmul.f32 %v1288_v2, %v189_v21 }
  0xaf   :  { %470 = vmatmul.f32.vlgmr.msra.gmra.mxu3 %v282_v20 }
  0xb0   :  { %v253_v24 = vadd.f32 %v1294_v4, %v233_v22 }
  0xb2   :  { %v269_v27 = vmax.f32 %v253_v24, 0.0 }
  0xb5   :  { %v192_v23 = vpop.f32.mrf.mxu0 }
  0xb6   :  { %v234_v25 = vmul.f32 %v1288_v2, %v192_v23 }
  0xb8   :  { %v254_v26 = vadd.f32 %v1294_v4, %v234_v25 }
  0xba   :  { %v270_v28 = vmax.f32 %v254_v26, 0.0 }
  0xbc   :  { %v283_v29 = vmax.f32 %v269_v27, %v270_v28 }
  0xbd   :  { %v195_v30 = vpop.f32.mrf.mxu0 }
  0xbe   :  { %328 = vmatmul.f32.gmra.mxu1 %v283_v29  ;;  %400 = vmatmul.f32.gmra.mxu2 %v283_v29  ;;  %v235_v31 = vmul.f32 %v1288_v2, %v195_v30 }
  0xbf   :  { %473 = vmatmul.f32.gmra.mxu3 %v283_v29 }
  0xc0   :  { %v255_v33 = vadd.f32 %v1294_v4, %v235_v31 }
  0xc2   :  { %v271_v36 = vmax.f32 %v255_v33, 0.0 }
  0xc5   :  { %v198_v32 = vpop.f32.mrf.mxu0 }
  0xc6   :  { %v236_v34 = vmul.f32 %v1288_v2, %v198_v32 }
  0xc8   :  { %v256_v35 = vadd.f32 %v1294_v4, %v236_v34 }
  0xca   :  { %v272_v37 = vmax.f32 %v256_v35, 0.0 }
  0xcc   :  { %v284_v38 = vmax.f32 %v271_v36, %v272_v37 }
  0xcd   :  { %v201_v39 = vpop.f32.mrf.mxu0 }
  0xce   :  { %331 = vmatmul.f32.gmra.mxu1 %v284_v38  ;;  %403 = vmatmul.f32.gmra.mxu2 %v284_v38  ;;  %v237_v40 = vmul.f32 %v1288_v2, %v201_v39 }
  0xcf   :  { %476 = vmatmul.f32.gmra.mxu3 %v284_v38 }
  0xd0   :  { %v257_v42 = vadd.f32 %v1294_v4, %v237_v40 }
  0xd2   :  { %v273_v45 = vmax.f32 %v257_v42, 0.0 }
  0xd5   :  { %v204_v41 = vpop.f32.mrf.mxu0 }
  0xd6   :  { %v238_v43 = vmul.f32 %v1288_v2, %v204_v41 }
  0xd8   :  { %v258_v44 = vadd.f32 %v1294_v4, %v238_v43 }
  0xda   :  { %v274_v46 = vmax.f32 %v258_v44, 0.0 }
  0xdc   :  { %v285_v47 = vmax.f32 %v273_v45, %v274_v46 }
  0xdd   :  { %v207_v48 = vpop.f32.mrf.mxu0 }
  0xde   :  { %334 = vmatmul.f32.gmra.mxu1 %v285_v47  ;;  %406 = vmatmul.f32.gmra.mxu2 %v285_v47  ;;  %v239_v49 = vmul.f32 %v1288_v2, %v207_v48 }
  0xdf   :  { %479 = vmatmul.f32.gmra.mxu3 %v285_v47 }
  0xe0   :  { %v259_v51 = vadd.f32 %v1294_v4, %v239_v49 }
  0xe2   :  { %v275_v54 = vmax.f32 %v259_v51, 0.0 }
  0xe5   :  { %v210_v50 = vpop.f32.mrf.mxu0 }
  0xe6   :  { %v240_v52 = vmul.f32 %v1288_v2, %v210_v50 }
  0xe8   :  { %v260_v53 = vadd.f32 %v1294_v4, %v240_v52 }
  0xea   :  { %v276_v55 = vmax.f32 %v260_v53, 0.0  ;;  %v613_v53 = vld [vmem:[#allocation7 + $0x168] sm:$0xff] }
  0xeb   :  { %616 = vmatpush.msrb.mxu2 %v613_v53  ;;  %v576_v53 = vld [vmem:[#allocation7 + $0x40] sm:$0xff] }
  0xec   :  { %v286_v56 = vmax.f32 %v275_v54, %v276_v55  ;;  %v614_v54 = vld [vmem:[#allocation7 + $0x170] sm:$0xff]  ;;  %v615_v55 = vld [vmem:[#allocation7 + $0x178] sm:$0xff] }
  0xed   :  { %v213_v57 = vpop.f32.mrf.mxu0  ;;  %636 = vmatpush.msrb.mxu3 %v614_v54  ;;  %656 = vmatpush.msrb.mxu1 %v615_v55  ;;  %v571_v55 = vld [vmem:[#allocation7 + $0x18] sm:$0xff] }
  0xee   :  { %337 = vmatmul.f32.gmra.mxu1 %v286_v56  ;;  %409 = vmatmul.f32.gmra.mxu2 %v286_v56  ;;  %v241_v58 = vmul.f32 %v1288_v2, %v213_v57  ;;  %v611_v57 = vld [vmem:[#allocation7 + $0x158] sm:$0xff] }
  0xef   :  { %482 = vmatmul.f32.gmra.mxu3 %v286_v56  ;;  %v610_v56 = vld [vmem:[#allocation7 + $0x150] sm:$0xff] }
  0xf0   :  { %v261_v60 = vadd.f32 %v1294_v4, %v241_v58  ;;  %v612_v58 = vld [vmem:[#allocation7 + $0x160] sm:$0xff]  ;;  %617 = vmatpush.msrb.mxu2 %v610_v56  ;;  %637 = vmatpush.msrb.mxu3 %v611_v57  ;;  %v573_v57 = vld [vmem:[#allocation7 + $0x28] sm:$0xff] }
  0xf1   :  { %657 = vmatpush.msrb.mxu1 %v612_v58  ;;  %v572_v56 = vld [vmem:[#allocation7 + $0x20] sm:$0xff] }
  0xf2   :  { %v277_v63 = vmax.f32 %v261_v60, 0.0  ;;  %v608_v60 = vld [vmem:[#allocation7 + $0x140] sm:$0xff] }
  0xf3   :  { %638 = vmatpush.msrb.mxu3 %v608_v60  ;;  %v568_v60 = vld [vmem:[#allocation7] sm:$0xff] }
  0xf5   :  { %v216_v59 = vpop.f32.mrf.mxu0 }
  0xf6   :  { %v242_v61 = vmul.f32 %v1288_v2, %v216_v59  ;;  %v607_v59 = vld [vmem:[#allocation7 + $0x138] sm:$0xff] }
  0xf7   :  { %618 = vmatpush.msrb.mxu2 %v607_v59 }
  0xf8   :  { %v262_v62 = vadd.f32 %v1294_v4, %v242_v61  ;;  %v609_v61 = vld [vmem:[#allocation7 + $0x148] sm:$0xff] }
  0xf9   :  { %658 = vmatpush.msrb.mxu1 %v609_v61  ;;  %v569_v61 = vld [vmem:[#allocation7 + $0x8] sm:$0xff] }
  0xfa   :  { %v278_v0 = vmax.f32 %v262_v62, 0.0  ;;  %v604_v62 = vld [vmem:[#allocation7 + $0x120] sm:$0xff] }
  0xfb   :  { %619 = vmatpush.msrb.mxu2 %v604_v62  ;;  %v570_v62 = vld [vmem:[#allocation7 + $0x10] sm:$0xff] }
  0xfc   :  { %v287_v1 = vmax.f32 %v277_v63, %v278_v0  ;;  %v605_v63 = vld [vmem:[#allocation7 + $0x128] sm:$0xff] }
  0xfd   :  { %v219_v3 = vpop.f32.mrf.mxu0  ;;  %639 = vmatpush.msrb.mxu3 %v605_v63  ;;  %v736_v63 = vld [vmem:[#allocation7 + $0x2f0] sm:$0xff] }
  0xfe   :  { %340 = vmatmul.f32.gmra.mxu1 %v287_v1  ;;  %412 = vmatmul.f32.gmra.mxu2 %v287_v1  ;;  %v243_v5 = vmul.f32 %v1288_v2, %v219_v3 }
  0xff   :  { %485 = vmatmul.f32.gmra.mxu3 %v287_v1  ;;  %v606_v1 = vld [vmem:[#allocation7 + $0x130] sm:$0xff] }
 0x100   :  { %v263_v7 = vadd.f32 %v1294_v4, %v243_v5  ;;  %v601_v5 = vld [vmem:[#allocation7 + $0x108] sm:$0xff]  ;;  %659 = vmatpush.msrb.mxu1 %v606_v1  ;;  %v732_v1 = vld [vmem:[#allocation7 + $0x2d0] sm:$0xff] }
 0x101   :  { %620 = vmatpush.msrb.mxu2 %v601_v5  ;;  %v734_v5 = vld [vmem:[#allocation7 + $0x2e0] sm:$0xff] }
 0x102   :  { %v279_v10 = vmax.f32 %v263_v7, 0.0 }
 0x105   :  { %v222_v6 = vpop.f32.mrf.mxu0 }
 0x106   :  { %v244_v8 = vmul.f32 %v1288_v2, %v222_v6  ;;  %v602_v6 = vld [vmem:[#allocation7 + $0x110] sm:$0xff] }
 0x107   :  { %640 = vmatpush.msrb.mxu3 %v602_v6  ;;  %v729_v6 = vld [vmem:[#allocation7 + $0x2b8] sm:$0xff] }
 0x108   :  { %v264_v9 = vadd.f32 %v1294_v4, %v244_v8  ;;  %v1336_v4 = vld [vmem:[%s1483_s6] ss:$0 sm:$0xff] }
 0x10a   :  { %v280_v11 = vmax.f32 %v264_v9, 0.0 }
 0x10c   :  { %v288_v12 = vmax.f32 %v279_v10, %v280_v11  ;;  %v603_v10 = vld [vmem:[#allocation7 + $0x118] sm:$0xff]  ;;  %v598_v11 = vld [vmem:[#allocation7 + $0xf0] sm:$0xff] }
 0x10d   :  { %660 = vmatpush.msrb.mxu1 %v603_v10  ;;  %621 = vmatpush.msrb.mxu2 %v598_v11  ;;  %v727_v10 = vld [vmem:[#allocation7 + $0x2a8] sm:$0xff]  ;;  %v728_v11 = vld [vmem:[#allocation7 + $0x2b0] sm:$0xff] }
 0x10e   :  { %343 = vmatmul.f32.gmra.mxu1 %v288_v12  ;;  %488 = vmatmul.f32.gmra.mxu3 %v288_v12  ;;  %v599_v12 = vld [vmem:[#allocation7 + $0xf8] sm:$0xff] }
 0x10f   :  { %641 = vmatpush.msrb.mxu3 %v599_v12  ;;  %v723_v12 = vld [vmem:[#allocation7 + $0x288] sm:$0xff] }
 0x11b   :  { %v323_v13 = vpop.f32.mrf.mxu1 }
 0x121   :  { %v395_v14 = vpop.f32.mrf.mxu2 }
 0x12b   :  { %v326_v15 = vpop.f32.mrf.mxu1 }
 0x12c   :  { %v416_v16 = vadd.f32 %v395_v14, %v326_v15  ;;  %v600_v15 = vld [vmem:[#allocation7 + $0x100] sm:$0xff] }
 0x12d   :  { %661 = vmatpush.msrb.mxu1 %v600_v15  ;;  %v720_v15 = vld [vmem:[#allocation7 + $0x270] sm:$0xff] }
 0x131   :  { %v398_v27 = vpop.f32.mrf.mxu2 }
 0x132   :  { %v471_v17 = vpop.f32.mrf.mxu3 }
 0x133   :  { %v492_v18 = vadd.f32 %v471_v17, %v323_v13  ;;  %v596_v17 = vld [vmem:[#allocation7 + $0xe0] sm:$0xff] }
 0x134   :  { %642 = vmatpush.msrb.mxu3 %v596_v17  ;;  %v722_v17 = vld [vmem:[#allocation7 + $0x280] sm:$0xff] }
 0x135   :  { %v518_v2 = vmul.f32 %v1330_v19, %v492_v18 }
 0x137   :  { %v530_v22 = vadd.f32 %v1336_v4, %v518_v2  ;;  %v597_v2 = vld [vmem:[#allocation7 + $0xe8] sm:$0xff] }
 0x138   :  { %662 = vmatpush.msrb.mxu1 %v597_v2  ;;  %v718_v2 = vld [vmem:[#allocation7 + $0x260] sm:$0xff] }
 0x139   :  { %v538_v25 = vmax.f32 %v530_v22, 0.0  ;;  %v594_v22 = vld [vmem:[#allocation7 + $0xd0] sm:$0xff] }
 0x13a   :  { %663 = vmatpush.msrb.mxu1 %v594_v22  ;;  %v715_v22 = vld [vmem:[#allocation7 + $0x248] sm:$0xff] }
 0x13b   :  { %v329_v28 = vpop.f32.mrf.mxu1 }
 0x13c   :  { %v417_v33 = vadd.f32 %v398_v27, %v329_v28 }
 0x141   :  { %v401_v30 = vpop.f32.mrf.mxu2 }
 0x142   :  { %v474_v20 = vpop.f32.mrf.mxu3 }
 0x143   :  { %v493_v21 = vadd.f32 %v474_v20, %v416_v16  ;;  %v595_v16 = vld [vmem:[#allocation7 + $0xd8] sm:$0xff]  ;;  %v592_v20 = vld [vmem:[#allocation7 + $0xc0] sm:$0xff] }
 0x144   :  { %622 = vmatpush.msrb.mxu2 %v595_v16  ;;  %v721_v16 = vld [vmem:[#allocation7 + $0x278] sm:$0xff] }
 0x145   :  { %v519_v23 = vmul.f32 %v1330_v19, %v493_v21  ;;  %v593_v21 = vld [vmem:[#allocation7 + $0xc8] sm:$0xff] }
 0x146   :  { %623 = vmatpush.msrb.mxu2 %v592_v20  ;;  %643 = vmatpush.msrb.mxu3 %v593_v21  ;;  %v719_v20 = vld [vmem:[#allocation7 + $0x268] sm:$0xff]  ;;  %v714_v21 = vld [vmem:[#allocation7 + $0x240] sm:$0xff] }
 0x147   :  { %v531_v24 = vadd.f32 %v1336_v4, %v519_v23 }
 0x149   :  { %v539_v26 = vmax.f32 %v531_v24, 0.0 }
 0x14b   :  { %v1341_v29 = vmax.f32 %v538_v25, %v539_v26  ;;  %v332_v31 = vpop.f32.mrf.mxu1  ;;  %v589_v25 = vld [vmem:[#allocation7 + $0xa8] sm:$0xff]  ;;  %v590_v26 = vld [vmem:[#allocation7 + $0xb0] sm:$0xff] }
 0x14c   :  { %v418_v38 = vadd.f32 %v401_v30, %v332_v31  ;;  %v591_v30 = vld [vmem:[#allocation7 + $0xb8] sm:$0xff]  ;;  %624 = vmatpush.msrb.mxu2 %v589_v25  ;;  %644 = vmatpush.msrb.mxu3 %v590_v26  ;;  %v712_v25 = vld [vmem:[#allocation7 + $0x230] sm:$0xff] }
 0x14d   :  { %664 = vmatpush.msrb.mxu1 %v591_v30  ;;  %v713_v26 = vld [vmem:[#allocation7 + $0x238] sm:$0xff]  ;;  %v710_v30 = vld [vmem:[#allocation7 + $0x220] sm:$0xff] }
 0x151   :  { %v404_v34 = vpop.f32.mrf.mxu2 }
 0x152   :  { %v477_v32 = vpop.f32.mrf.mxu3 }
 0x153   :  { %v494_v37 = vadd.f32 %v477_v32, %v417_v33  ;;  %v586_v33 = vld [vmem:[#allocation7 + $0x90] sm:$0xff] }
 0x154   :  { %625 = vmatpush.msrb.mxu2 %v586_v33  ;;  %v706_v33 = vld [vmem:[#allocation7 + $0x200] sm:$0xff] }
 0x155   :  { %v520_v39 = vmul.f32 %v1330_v19, %v494_v37  ;;  %v584_v37 = vld [vmem:[#allocation7 + $0x80] sm:$0xff] }
 0x157   :  { %v532_v43 = vadd.f32 %v1336_v4, %v520_v39 }
 0x159   :  { %v540_v45 = vmax.f32 %v532_v43, 0.0 }
 0x15b   :  { %v335_v35 = vpop.f32.mrf.mxu1 }
 0x15c   :  { %v419_v36 = vadd.f32 %v404_v34, %v335_v35  ;;  %v587_v34 = vld [vmem:[#allocation7 + $0x98] sm:$0xff]  ;;  %v588_v35 = vld [vmem:[#allocation7 + $0xa0] sm:$0xff] }
 0x15d   :  { %645 = vmatpush.msrb.mxu3 %v587_v34  ;;  %665 = vmatpush.msrb.mxu1 %v588_v35  ;;  %v707_v34 = vld [vmem:[#allocation7 + $0x208] sm:$0xff]  ;;  %v702_v35 = vld [vmem:[#allocation7 + $0x1e0] sm:$0xff] }
 0x15f   :  { %646 = vmatpush.msrb.mxu3 %v584_v37  ;;  %v704_v37 = vld [vmem:[#allocation7 + $0x1f0] sm:$0xff] }
 0x161   :  { %v407_v47 = vpop.f32.mrf.mxu2 }
 0x162   :  { %v480_v40 = vpop.f32.mrf.mxu3 }
 0x163   :  { %v495_v41 = vadd.f32 %v480_v40, %v418_v38  ;;  %v585_v38 = vld [vmem:[#allocation7 + $0x88] sm:$0xff] }
 0x164   :  { %666 = vmatpush.msrb.mxu1 %v585_v38  ;;  %v699_v38 = vld [vmem:[#allocation7 + $0x1c8] sm:$0xff] }
 0x165   :  { %v521_v42 = vmul.f32 %v1330_v19, %v495_v41  ;;  %v580_v41 = vld [vmem:[#allocation7 + $0x60] sm:$0xff] }
 0x167   :  { %v533_v44 = vadd.f32 %v1336_v4, %v521_v42  ;;  %v581_v42 = vld [vmem:[#allocation7 + $0x68] sm:$0xff] }
 0x168   :  { %647 = vmatpush.msrb.mxu3 %v581_v42  ;;  %v697_v42 = vld [vmem:[#allocation7 + $0x1b8] sm:$0xff] }
 0x169   :  { %v541_v46 = vmax.f32 %v533_v44, 0.0  ;;  %v582_v44 = vld [vmem:[#allocation7 + $0x70] sm:$0xff] }
 0x16a   :  { %667 = vmatpush.msrb.mxu1 %v582_v44  ;;  %v693_v44 = vld [vmem:[#allocation7 + $0x198] sm:$0xff] }
 0x16b   :  { %v338_v48 = vpop.f32.mrf.mxu1  ;;  %v548_v49 = vmax.f32 %v540_v45, %v541_v46  ;;  %v577_v46 = vld [vmem:[#allocation7 + $0x48] sm:$0xff] }
 0x16c   :  { %v420_v50 = vadd.f32 %v407_v47, %v338_v48  ;;  %v578_v47 = vld [vmem:[#allocation7 + $0x50] sm:$0xff]  ;;  %v579_v48 = vld [vmem:[#allocation7 + $0x58] sm:$0xff] }
 0x16d   :  { %550 = vrot.lane.b32.xlu0 %v548_v49, %s1133_s5  ;;  %648 = vmatpush.msrb.mxu3 %v578_v47 }
 0x16e   :  { %668 = vmatpush.msrb.mxu1 %v579_v48 }
 0x170   :  { %669 = vmatpush.msrb.mxu1 %v576_v53  ;;  %v861_v53 = vld [vmem:[%s1487_s10 + $0xd0] sm:$0xff] }
 0x171   :  { %v410_v7 = vpop.f32.mrf.mxu2 }
 0x172   :  { %v483_v51 = vpop.f32.mrf.mxu3  ;;  %670 = vmatpush.msrb.mxu1 %v573_v57 }
 0x173   :  { %v496_v52 = vadd.f32 %v483_v51, %v419_v36  ;;  %v583_v36 = vld [vmem:[#allocation7 + $0x78] sm:$0xff]  ;;  %v574_v51 = vld [vmem:[#allocation7 + $0x30] sm:$0xff] }
 0x174   :  { %626 = vmatpush.msrb.mxu2 %v583_v36  ;;  %671 = vmatpush.msrb.mxu1 %v570_v62  ;;  %v703_v36 = vld [vmem:[#allocation7 + $0x1e8] sm:$0xff]  ;;  %v843_v62 = vld [vmem:[%s1487_s10 + $0x40] sm:$0xff] }
 0x175   :  { %v522_v0 = vmul.f32 %v1330_v19, %v496_v52  ;;  %v575_v52 = vld [vmem:[#allocation7 + $0x38] sm:$0xff] }
 0x176   :  { %627 = vmatpush.msrb.mxu2 %v580_v41  ;;  %649 = vmatpush.msrb.mxu3 %v575_v52  ;;  %v696_v41 = vld [vmem:[#allocation7 + $0x1b0] sm:$0xff] }
 0x177   :  { %v534_v13 = vadd.f32 %v1336_v4, %v522_v0  ;;  %v737_v0 = vld [vmem:[#allocation7 + $0x2f8] sm:$0xff]  ;;  %v865_v52 = vld [vmem:[%s1487_s10 + $0xf0] sm:$0xff] }
 0x178   :  { %628 = vmatpush.msrb.mxu2 %v577_v46  ;;  %650 = vmatpush.msrb.mxu3 %v572_v56  ;;  %v695_v46 = vld [vmem:[#allocation7 + $0x1a8] sm:$0xff]  ;;  %v855_v56 = vld [vmem:[%s1487_s10 + $0xa0] sm:$0xff] }
 0x179   :  { %v542_v23 = vmax.f32 %v534_v13, 0.0  ;;  %778 = vmatpush.msra.mxu1 %v737_v0  ;;  %v724_v13 = vld [vmem:[#allocation7 + $0x290] sm:$0xff]  ;;  %873 = vmatpush.msrb.mxu0 %v865_v52  ;;  %v864_v0 = vld [vmem:[%s1487_s10 + $0xe8] sm:$0xff]  ;;  %v939_v52 = vld [vmem:[#allocation9 + $0xc0] sm:$0xff] }
 0x17a   :  { %629 = vmatpush.msrb.mxu2 %v574_v51  ;;  %651 = vmatpush.msrb.mxu3 %v569_v61  ;;  %v692_v51 = vld [vmem:[#allocation7 + $0x190] sm:$0xff] }
 0x17b   :  { %v341_v8 = vpop.f32.mrf.mxu1  ;;  %779 = vmatpush.msra.mxu1 %v734_v5  ;;  %v845_v61 = vld [vmem:[%s1487_s10 + $0x50] sm:$0xff]  ;;  %v858_v5 = vld [vmem:[%s1487_s10 + $0xb8] sm:$0xff] }
 0x17c   :  { %v421_v39 = vadd.f32 %v410_v7, %v341_v8  ;;  %630 = vmatpush.msrb.mxu2 %v571_v55  ;;  %758 = vmatpush.msra.mxu3 %v736_v63  ;;  %v730_v7 = vld [vmem:[#allocation7 + $0x2c0] sm:$0xff]  ;;  %v731_v8 = vld [vmem:[#allocation7 + $0x2c8] sm:$0xff]  ;;  %v857_v55 = vld [vmem:[%s1487_s10 + $0xb0] sm:$0xff] }
 0x17d   :  { %780 = vmatpush.msra.mxu1 %v731_v8  ;;  %v866_v63 = vld [vmem:[%s1487_s10 + $0xf8] sm:$0xff]  ;;  %v852_v8 = vld [vmem:[%s1487_s10 + $0x88] sm:$0xff] }
 0x17e   :  { %631 = vmatpush.msrb.mxu2 %v568_v60  ;;  %v849_v60 = vld [vmem:[%s1487_s10 + $0x70] sm:$0xff] }
 0x17f   :  { %781 = vmatpush.msra.mxu1 %v728_v11  ;;  %v846_v11 = vld [vmem:[%s1487_s10 + $0x58] sm:$0xff] }
 0x181   :  { %v413_v27 = vpop.f32.mrf.mxu2 }
 0x182   :  { %v486_v3 = vpop.f32.mrf.mxu3 }
 0x183   :  { %v497_v9 = vadd.f32 %v486_v3, %v420_v50  ;;  %v733_v3 = vld [vmem:[#allocation7 + $0x2d8] sm:$0xff] }
 0x184   :  { %759 = vmatpush.msra.mxu3 %v733_v3  ;;  %v860_v3 = vld [vmem:[%s1487_s10 + $0xc8] sm:$0xff] }
 0x185   :  { %v523_v14 = vmul.f32 %v1330_v19, %v497_v9  ;;  %v726_v9 = vld [vmem:[#allocation7 + $0x2a0] sm:$0xff] }
 0x186   :  { %760 = vmatpush.msra.mxu3 %v730_v7  ;;  %v854_v7 = vld [vmem:[%s1487_s10 + $0x98] sm:$0xff] }
 0x187   :  { %v535_v18 = vadd.f32 %v1336_v4, %v523_v14  ;;  %v725_v14 = vld [vmem:[#allocation7 + $0x298] sm:$0xff] }
 0x188   :  { %761 = vmatpush.msra.mxu3 %v727_v10  ;;  %782 = vmatpush.msra.mxu1 %v725_v14  ;;  %v848_v10 = vld [vmem:[%s1487_s10 + $0x68] sm:$0xff] }
 0x189   :  { %v543_v24 = vmax.f32 %v535_v18, 0.0  ;;  %v717_v18 = vld [vmem:[#allocation7 + $0x258] sm:$0xff]  ;;  %v844_v14 = vld [vmem:[%s1487_s10 + $0x48] sm:$0xff] }
 0x18a   :  { %762 = vmatpush.msra.mxu3 %v724_v13  ;;  %783 = vmatpush.msra.mxu1 %v722_v17  ;;  %v837_v13 = vld [vmem:[%s1487_s10 + $0x10] sm:$0xff] }
 0x18b   :  { %v344_v28 = vpop.f32.mrf.mxu1  ;;  %v1352_v31 = vmax.f32 %v542_v23, %v543_v24  ;;  %v716_v23 = vld [vmem:[#allocation7 + $0x250] sm:$0xff]  ;;  %v711_v24 = vld [vmem:[#allocation7 + $0x228] sm:$0xff] }
 0x18c   :  { %v422_v32 = vadd.f32 %v413_v27, %v344_v28  ;;  %763 = vmatpush.msra.mxu3 %v721_v16  ;;  %784 = vmatpush.msra.mxu1 %v719_v20  ;;  %v708_v27 = vld [vmem:[#allocation7 + $0x210] sm:$0xff]  ;;  %v709_v28 = vld [vmem:[#allocation7 + $0x218] sm:$0xff] }
 0x18d   :  { %v838_v20 = vld [vmem:[%s1487_s10 + $0x18] sm:$0xff] }
 0x18e   :  { %v525_v40 = vmul.f32 %v1330_v19, %v422_v32  ;;  %764 = vmatpush.msra.mxu3 %v718_v2  ;;  %785 = vmatpush.msra.mxu1 %v716_v23  ;;  %v705_v32 = vld [vmem:[#allocation7 + $0x1f8] sm:$0xff]  ;;  %v840_v2 = vld [vmem:[%s1487_s10 + $0x28] sm:$0xff] }
 0x190   :  { %v537_v49 = vadd.f32 %v1336_v4, %v525_v40  ;;  %765 = vmatpush.msra.mxu3 %v715_v22  ;;  %786 = vmatpush.msra.mxu1 %v713_v26  ;;  %v701_v40 = vld [vmem:[#allocation7 + $0x1d8] sm:$0xff]  ;;  %v1460_v22 = vld [vmem:[%s1485_s8] sm:$0x7]  ;;  %v929_v26 = vld [vmem:[#allocation9 + $0x70] sm:$0xff] }
 0x191   :  { %v489_v43 = vpop.f32.mrf.mxu3  ;;  %v809_v23 = vperm.slane %v1460_v22, 0 }
 0x192   :  { %v498_v45 = vadd.f32 %v489_v43, %v421_v39  ;;  %v545_v58 = vmax.f32 %v537_v49, 0.0  ;;  %766 = vmatpush.msra.mxu3 %v712_v25  ;;  %787 = vmatpush.msra.mxu1 %v710_v30  ;;  %v700_v39 = vld [vmem:[#allocation7 + $0x1d0] sm:$0xff]  ;;  %v698_v43 = vld [vmem:[#allocation7 + $0x1c0] sm:$0xff]  ;;  %v930_v25 = vld [vmem:[#allocation9 + $0x78] sm:$0xff] }
 0x193   :  { %v690_v49 = vld [vmem:[#allocation7 + $0x180] sm:$0xff]  ;;  %v946_v30 = vld [vmem:[#allocation9 + $0xf8] sm:$0xff] }
 0x194   :  { %v524_v50 = vmul.f32 %v1330_v19, %v498_v45  ;;  %767 = vmatpush.msra.mxu3 %v709_v28  ;;  %788 = vmatpush.msra.mxu1 %v707_v34  ;;  %v694_v45 = vld [vmem:[#allocation7 + $0x1a0] sm:$0xff]  ;;  %v928_v34 = vld [vmem:[#allocation9 + $0x68] sm:$0xff] }
 0x196   :  { %v536_v54 = vadd.f32 %v1336_v4, %v524_v50  ;;  %v735_v4 = vld [vmem:[#allocation7 + $0x2e8] sm:$0xff]  ;;  %768 = vmatpush.msra.mxu3 %v706_v33  ;;  %789 = vmatpush.msra.mxu1 %v704_v37 }
 0x197   :  { %738 = vmatpush.msra.mxu2 %v735_v4  ;;  %v691_v50 = vld [vmem:[#allocation7 + $0x188] sm:$0xff]  ;;  %v841_v4 = vld [vmem:[%s1487_s10 + $0x30] sm:$0xff] }
 0x198   :  { %v544_v59 = vmax.f32 %v536_v54, 0.0  ;;  %769 = vmatpush.msra.mxu3 %v703_v36  ;;  %790 = vmatpush.msra.mxu1 %v701_v40  ;;  %v859_v54 = vld [vmem:[%s1487_s10 + $0xc0] sm:$0xff]  ;;  %v944_v36 = vld [vmem:[#allocation9 + $0xe8] sm:$0xff] }
 0x199   :  { %739 = vmatpush.msra.mxu2 %v732_v1  ;;  %v862_v1 = vld [vmem:[%s1487_s10 + $0xd8] sm:$0xff]  ;;  %v927_v40 = vld [vmem:[#allocation9 + $0x60] sm:$0xff] }
 0x19a   :  { %v549_v19 = vmax.f32 %v544_v59, %v545_v58  ;;  %770 = vmatpush.msra.mxu3 %v700_v39  ;;  %791 = vmatpush.msra.mxu1 %v698_v43  ;;  %v853_v59 = vld [vmem:[%s1487_s10 + $0x90] sm:$0xff]  ;;  %v926_v43 = vld [vmem:[#allocation9 + $0x58] sm:$0xff] }
 0x19b   :  { %740 = vmatpush.msra.mxu2 %v729_v6  ;;  %v856_v6 = vld [vmem:[%s1487_s10 + $0xa8] sm:$0xff] }
 0x19c   :  { %552 = vrot.lane.b32.xlu0 %v549_v19, %s1133_s5  ;;  %771 = vmatpush.msra.mxu3 %v697_v42  ;;  %v851_v19 = vld [vmem:[%s1487_s10 + $0x80] sm:$0xff] }
 0x19d   :  { %741 = vmatpush.msra.mxu2 %v726_v9  ;;  %792 = vmatpush.msra.mxu1 %v695_v46  ;;  %v850_v9 = vld [vmem:[%s1487_s10 + $0x78] sm:$0xff]  ;;  %v925_v46 = vld [vmem:[#allocation9 + $0x50] sm:$0xff] }
 0x19e   :  { %772 = vmatpush.msra.mxu3 %v694_v45  ;;  %v942_v45 = vld [vmem:[#allocation9 + $0xd8] sm:$0xff] }
 0x19f   :  { %742 = vmatpush.msra.mxu2 %v723_v12  ;;  %793 = vmatpush.msra.mxu1 %v692_v51  ;;  %v839_v12 = vld [vmem:[%s1487_s10 + $0x20] sm:$0xff] }
 0x1a0   :  { %773 = vmatpush.msra.mxu3 %v691_v50  ;;  %v923_v51 = vld [vmem:[#allocation9 + $0x40] sm:$0xff] }
 0x1a1   :  { %743 = vmatpush.msra.mxu2 %v720_v15  ;;  %v842_v15 = vld [vmem:[%s1487_s10 + $0x38] sm:$0xff] }
 0x1a3   :  { %744 = vmatpush.msra.mxu2 %v717_v18  ;;  %v835_v18 = vld [vmem:[%s1487_s10] sm:$0xff] }
 0x1a5   :  { %745 = vmatpush.msra.mxu2 %v714_v21  ;;  %v836_v21 = vld [vmem:[%s1487_s10 + $0x8] sm:$0xff] }
 0x1a7   :  { %746 = vmatpush.msra.mxu2 %v711_v24  ;;  %v810_v24 = vperm.slane %v1460_v22, 1 }
 0x1a9   :  { %747 = vmatpush.msra.mxu2 %v708_v27 }
 0x1ab   :  { %748 = vmatpush.msra.mxu2 %v705_v32 }
 0x1ad   :  { %749 = vmatpush.msra.mxu2 %v702_v35  ;;  %v945_v35 = vld [vmem:[#allocation9 + $0xf0] sm:$0xff] }
 0x1af   :  { %750 = vmatpush.msra.mxu2 %v699_v38 }
 0x1b1   :  { %751 = vmatpush.msra.mxu2 %v696_v41  ;;  %v943_v41 = vld [vmem:[#allocation9 + $0xe0] sm:$0xff] }
 0x1b3   :  { %752 = vmatpush.msra.mxu2 %v693_v44 }
 0x1b5   :  { %753 = vmatpush.msra.mxu2 %v690_v49  ;;  %v940_v49 = vld [vmem:[#allocation9 + $0xc8] sm:$0xff] }
 0x1df   :  { %v551_v47 = vpop.permute.xlu0 %550 }
 0x1e0   :  { %v554_v48 = vadd.f32 %v551_v47, %v1341_v29  ;;  %v863_v29 = vld [vmem:[%s1487_s10 + $0xe0] sm:$0xff]  ;;  %v941_v47 = vld [vmem:[#allocation9 + $0xd0] sm:$0xff] }
 0x1e1   :  { %874 = vmatpush.msrb.mxu0 %v863_v29 }
 0x1e2   :  { %632 = vmatmul.f32.vlgmr.msrb.gmra.mxu2 %v554_v48  ;;  %652 = vmatmul.f32.vlgmr.msrb.gmra.mxu3 %v554_v48 }
 0x1e3   :  { %672 = vmatmul.f32.vlgmr.msrb.gmra.mxu1 %v554_v48  ;;  %875 = vmatpush.msrb.mxu0 %v861_v53  ;;  %v924_v48 = vld [vmem:[#allocation9 + $0x48] sm:$0xff]  ;;  %v922_v53 = vld [vmem:[#allocation9 + $0x38] sm:$0xff] }
 0x1e4   :  { %893 = vmatpush.msrb.mxu2 %v866_v63  ;;  %951 = vmatpush.msrb.mxu3 %v930_v25 }
 0x1e5   :  { %876 = vmatpush.msrb.mxu0 %v859_v54  ;;  %971 = vmatpush.msrb.mxu1 %v946_v30 }
 0x1e6   :  { %894 = vmatpush.msrb.mxu2 %v864_v0  ;;  %952 = vmatpush.msrb.mxu3 %v929_v26  ;;  %v919_v0 = vld [vmem:[#allocation9 + $0x20] sm:$0xff] }
 0x1e7   :  { %877 = vmatpush.msrb.mxu0 %v857_v55  ;;  %972 = vmatpush.msrb.mxu1 %v945_v35  ;;  %v811_v55 = vperm.slane %v1460_v22, 2 }
 0x1e8   :  { %895 = vmatpush.msrb.mxu2 %v862_v1  ;;  %953 = vmatpush.msrb.mxu3 %v928_v34 }
 0x1e9   :  { %878 = vmatpush.msrb.mxu0 %v855_v56  ;;  %973 = vmatpush.msrb.mxu1 %v944_v36 }
 0x1ea   :  { %896 = vmatpush.msrb.mxu2 %v860_v3  ;;  %954 = vmatpush.msrb.mxu3 %v927_v40  ;;  %v918_v3 = vld [vmem:[#allocation9 + $0x18] sm:$0xff] }
 0x1eb   :  { %879 = vmatpush.msrb.mxu0 %v853_v59  ;;  %974 = vmatpush.msrb.mxu1 %v943_v41  ;;  %v921_v59 = vld [vmem:[#allocation9 + $0x30] sm:$0xff] }
 0x1ec   :  { %897 = vmatpush.msrb.mxu2 %v858_v5  ;;  %955 = vmatpush.msrb.mxu3 %v926_v43 }
 0x1ed   :  { %880 = vmatpush.msrb.mxu0 %v851_v19  ;;  %975 = vmatpush.msrb.mxu1 %v942_v45 }
 0x1ee   :  { %898 = vmatpush.msrb.mxu2 %v856_v6  ;;  %956 = vmatpush.msrb.mxu3 %v925_v46 }
 0x1ef   :  { %881 = vmatpush.msrb.mxu0 %v849_v60  ;;  %976 = vmatpush.msrb.mxu1 %v941_v47 }
 0x1f0   :  { %899 = vmatpush.msrb.mxu2 %v854_v7  ;;  %957 = vmatpush.msrb.mxu3 %v924_v48 }
 0x1f1   :  { %977 = vmatpush.msrb.mxu1 %v940_v49 }
 0x1f2   :  { %900 = vmatpush.msrb.mxu2 %v852_v8  ;;  %958 = vmatpush.msrb.mxu3 %v923_v51 }
 0x1f3   :  { %978 = vmatpush.msrb.mxu1 %v939_v52 }
 0x1f4   :  { %901 = vmatpush.msrb.mxu2 %v850_v9  ;;  %959 = vmatpush.msrb.mxu3 %v922_v53  ;;  %v917_v9 = vld [vmem:[#allocation9 + $0x10] sm:$0xff] }
 0x1f6   :  { %902 = vmatpush.msrb.mxu2 %v848_v10  ;;  %960 = vmatpush.msrb.mxu3 %v921_v59  ;;  %v936_v10 = vld [vmem:[#allocation9 + $0xa8] sm:$0xff] }
 0x1f8   :  { %903 = vmatpush.msrb.mxu2 %v846_v11  ;;  %v916_v11 = vld [vmem:[#allocation9 + $0x8] sm:$0xff] }
 0x1fa   :  { %904 = vmatpush.msrb.mxu2 %v844_v14  ;;  %v934_v14 = vld [vmem:[#allocation9 + $0x98] sm:$0xff] }
 0x1fc   :  { %905 = vmatpush.msrb.mxu2 %v842_v15  ;;  %v933_v15 = vld [vmem:[#allocation9 + $0x90] sm:$0xff] }
 0x1fe   :  { %906 = vmatpush.msrb.mxu2 %v840_v2 }
 0x200   :  { %907 = vmatpush.msrb.mxu2 %v838_v20 }
 0x202   :  { %908 = vmatpush.msrb.mxu2 %v836_v21 }
 0x20e   :  { %v553_v57 = vpop.permute.xlu0 %552 }
 0x20f   :  { %v555_v58 = vadd.f32 %v553_v57, %v1352_v31  ;;  %v847_v31 = vld [vmem:[%s1487_s10 + $0x60] sm:$0xff] }
 0x210   :  { %882 = vmatpush.msrb.mxu0 %v847_v31  ;;  %v1038_v57 = vld [vmem:[%s1486_s9] ss:$0 sm:$0xff]  ;;  %v937_v31 = vld [vmem:[#allocation9 + $0xb0] sm:$0xff] }
 0x211   :  { %754 = vmatmul.f32.vlgmr.msra.gmra.mxu2 %v555_v58  ;;  %774 = vmatmul.f32.vlgmr.msra.gmra.mxu3 %v555_v58 }
 0x212   :  { %794 = vmatmul.f32.vlgmr.msra.gmra.mxu1 %v555_v58  ;;  %883 = vmatpush.msrb.mxu0 %v845_v61  ;;  %v938_v58 = vld [vmem:[#allocation9 + $0xb8] sm:$0xff]  ;;  %v920_v61 = vld [vmem:[#allocation9 + $0x28] sm:$0xff] }
 0x213   :  { %979 = vmatpush.msrb.mxu1 %v938_v58  ;;  %961 = vmatpush.msrb.mxu3 %v920_v61 }
 0x214   :  { %884 = vmatpush.msrb.mxu0 %v843_v62 }
 0x215   :  { %980 = vmatpush.msrb.mxu1 %v937_v31  ;;  %962 = vmatpush.msrb.mxu3 %v919_v0 }
 0x216   :  { %885 = vmatpush.msrb.mxu0 %v841_v4 }
 0x217   :  { %963 = vmatpush.msrb.mxu3 %v918_v3  ;;  %981 = vmatpush.msrb.mxu1 %v936_v10 }
 0x218   :  { %886 = vmatpush.msrb.mxu0 %v839_v12  ;;  %v935_v12 = vld [vmem:[#allocation9 + $0xa0] sm:$0xff] }
 0x219   :  { %964 = vmatpush.msrb.mxu3 %v917_v9  ;;  %982 = vmatpush.msrb.mxu1 %v935_v12 }
 0x21a   :  { %887 = vmatpush.msrb.mxu0 %v837_v13  ;;  %v915_v13 = vld [vmem:[#allocation9] sm:$0xff] }
 0x21b   :  { %965 = vmatpush.msrb.mxu3 %v916_v11  ;;  %983 = vmatpush.msrb.mxu1 %v934_v14 }
 0x21c   :  { %888 = vmatpush.msrb.mxu0 %v835_v18  ;;  %v867_v18 = vld [vmem:[%s1488_s11] sm:$0x3] }
 0x21d   :  { %966 = vmatpush.msrb.mxu3 %v915_v13  ;;  %984 = vmatpush.msrb.mxu1 %v933_v15  ;;  %v869_v2 = vperm.slane %v867_v18, 0 }
 0x260   :  { %v673_v37 = vpop.f32.mrf.mxu1 }
 0x265   :  { %v633_v16 = vpop.f32.mrf.mxu2  ;;  %v653_v17 = vpop.f32.mrf.mxu3 }
 0x28f   :  { %v795_v50 = vpop.f32.mrf.mxu1 }
 0x290   :  { %v800_v54 = vadd.f32 %v795_v50, %v673_v37 }
 0x292   :  { %v817_v62 = vadd.f32 %v811_v55, %v800_v54 }
 0x294   :  { %v755_v27 = vpop.f32.mrf.mxu2  ;;  %v775_v28 = vpop.f32.mrf.mxu3 }
 0x295   :  { %v798_v32 = vadd.f32 %v755_v27, %v633_v16  ;;  %v799_v33 = vadd.f32 %v775_v28, %v653_v17  ;;  %v932_v16 = vld [vmem:[#allocation9 + $0x88] sm:$0xff]  ;;  %v931_v17 = vld [vmem:[#allocation9 + $0x80] sm:$0xff] }
 0x296   :  { %985 = vmatpush.msrb.mxu1 %v932_v16  ;;  %v1039_v27 = vld [vmem:[%s1490_s13] ss:$0 sm:$0xff] }
 0x297   :  { %v815_v38 = vadd.f32 %v809_v23, %v798_v32  ;;  %v816_v39 = vadd.f32 %v810_v24, %v799_v33  ;;  %v870_v23 = vperm.slane %v867_v18, 1 }
 0x298   :  { %986 = vmatpush.msrb.mxu1 %v931_v17 }
 0x299   :  { %v818_v42 = vmul.f32 0.5, %v815_v38  ;;  %v822_v44 = vmul.f32 0.5, %v816_v39 }
 0x29b   :  { %1040 = vtanh.f32 %v818_v42 }
 0x29c   :  { %1042 = vtanh.f32 %v822_v44 }
 0x2a1   :  { %v1041_v29 = vpop.eup %1040 }
 0x2a2   :  { %v820_v56 = vadd.f32 1.0, %v1041_v29  ;;  %v1043_v19 = vpop.eup %1042 }
 0x2a3   :  { %v824_v63 = vadd.f32 1.0, %v1043_v19 }
 0x2a4   :  { %v821_v60 = vmul.f32 0.5, %v820_v56 }
 0x2a5   :  { %v825_v5 = vmul.f32 0.5, %v824_v63 }
 0x2a6   :  { %v830_v4 = vmul.f32 %v1038_v57, %v821_v60 }
 0x2a7   :  { %v833_v6 = vsub.f32 1.0, %v825_v5 }
 0x2a8   :  { %v831_v1 = vadd.f32 %v830_v4, %v817_v62 }
 0x2aa   :  { %1044 = vtanh.f32 %v831_v1 }
 0x2b0   :  { %v1045_v7 = vpop.eup %1044 }
 0x2b1   :  { %v834_v8 = vmul.f32 %v1045_v7, %v833_v6 }
 0x2b3   :  { %889 = vmatmul.f32.vlgmr.msrb.gmra.mxu0 %v834_v8  ;;  %909 = vmatmul.f32.vlgmr.msrb.gmra.mxu2 %v834_v8 }
 0x330   :  { %v890_v20 = vpop.f32.mrf.mxu0 }
 0x331   :  { %v891_v21 = vadd.f32 %v890_v20, %v869_v2 }
 0x333   :  { %v913_v22 = vmax.f32 %v891_v21, 0.0 }
 0x335   :  { %967 = vmatmul.f32.vlgmr.msrb.gmra.mxu3 %v913_v22 }
 0x336   :  { %v910_v24 = vpop.f32.mrf.mxu2 }
 0x337   :  { %v911_v25 = vadd.f32 %v910_v24, %v870_v23 }
 0x339   :  { %v914_v26 = vmax.f32 %v911_v25, 0.0 }
 0x33b   :  { %987 = vmatmul.f32.vlgmr.msrb.gmra.mxu1 %v914_v26 }
 0x3b8   :  { %v968_v28 = vpop.f32.mrf.mxu3  ;;  %v988_v32 = vpop.f32.mrf.mxu1 }
 0x3b9   :  { %v969_v30 = vadd.f32 %v1039_v27, %v968_v28 }
 0x3bb   :  { %v989_v33 = vadd.f32 %v988_v32, %v969_v30 }
 0x3bd   :  { %991 = vmax.xlane.f32.xlu1 %v989_v33 }
 0x430   :  { %v992_v34 = vpop.xlane.xlu1 %991 }
 0x431   :  { %v993_v35 = vsub.f32 %v989_v33, %v992_v34 }
 0x433   :  { %v994_v36 = vmul.f32 1.442695, %v993_v35 }
 0x435   :  { %1046 = vpow2.f32 %v994_v36 }
 0x43b   :  { %v1047_v37 = vpop.eup %1046 }
 0x43c   :  { %996 = vadd.xlane.f32.xlu1 %v1047_v37 }
 0x4af   :  { %v997_v38 = vpop.xlane.xlu1 %996 }
 0x4b0   :  { %1048 = vlog2.f32 %v997_v38 }
 0x4b6   :  { %v1049_v39 = vpop.eup %1048 }
 0x4b7   :  { %v999_v40 = vmul.f32 0.6931472, %v1049_v39 }
 0x4b9   :  { %v1000_v41 = vadd.f32 %v999_v40, %v992_v34 }
 0x4bb   :  { %v1001_v42 = vsub.f32 %v989_v33, %v1000_v41 }
 0x4bd   :  { %1002 = vst [vmem:[%s1491_s14] sm:$0xff] %v1001_v42 }
 0x4be   :  { %1007 = vsyncpa [#allocation6], 1 }
 0x4bf   :  { %1008 = vsyncpa [#allocation8], 1 }

</bundles_post_ra>
